<compile_context>
chip_gen: v7x
topology: tpu7x:2x2x1
jax: 0.10.0
libtpu: 0.0.40
codegen_flags: <defaults>
</compile_context>

<pallas_src>
import jax
import jax.numpy as jnp
import numpy as np
from jax.experimental import pallas as pl
from jax.experimental.pallas import tpu as pltpu

_K = 5  # LeNet conv kernel size


# ---------------------------------------------------------------------------
# Fused forward kernel
# ---------------------------------------------------------------------------
def _lenet_fused_kernel(x_ref, c1m_ref, c1b_ref, p1_ref,
                        c2m_ref, c2b_ref, p2_ref,
                        c3m_ref, c3b_ref, fcw_ref, fcb_ref, o_ref):
    bn = o_ref.shape[0]                     # images in this batch block

    def conv_tanh(a2d, h, ho, mat_ref, bias_ref):
        # a2d: (bn*h, W*Cin) -> (bn*ho, Wo*Cout) = tanh(A_cat @ M_cat + bias)
        # A_cat: the 5 row-shifted windows concatenated on the lane axis
        # (single deep-K MXU push instead of 5 shallow ones).
        wc = a2d.shape[1]
        a3d = a2d.reshape(bn, h, wc)
        a_cat = jnp.concatenate([a3d[:, i:i + ho, :] for i in range(_K)],
                                axis=-1).reshape(bn * ho, _K * wc)
        acc = jnp.dot(a_cat, mat_ref[...], preferred_element_type=jnp.float32)
        return jnp.tanh(acc + bias_ref[...])

    def avgpool(a2d, pmat_ref):
        # rows: sum adjacent image rows; cols: 0.25 block-pooling matmul.
        rows, wc = a2d.shape
        a3d = a2d.reshape(rows // 2, 2, wc)
        hsum = a3d[:, 0, :] + a3d[:, 1, :]
        return jnp.dot(hsum, pmat_ref[...], preferred_element_type=jnp.float32)

    a = x_ref[...]                               # (bn*32, 32)   [W=32, Cin=1]
    a = conv_tanh(a, 32, 28, c1m_ref, c1b_ref)   # (bn*28, 168)  [28 x 6]
    a = avgpool(a, p1_ref)                       # (bn*14, 84)   [14 x 6]
    a = conv_tanh(a, 14, 10, c2m_ref, c2b_ref)   # (bn*10, 160)  [10 x 16]
    a = avgpool(a, p2_ref)                       # (bn*5,  80)   [5 x 16]
    a = conv_tanh(a, 5, 1, c3m_ref, c3b_ref)     # (bn,   120)
    o_ref[...] = jnp.tanh(                       # (bn, 128) lane-dense store
        jnp.dot(a, fcw_ref[...], preferred_element_type=jnp.float32)
        + fcb_ref[...])


# ---------------------------------------------------------------------------
# One-time parameter preparation (all layout / transpose work hoisted here)
# ---------------------------------------------------------------------------
def prepare_params(p):
    def conv_cat_mat(w, width):
        # w: (Cout, Cin, 5, 5) -> (5*width*Cin, (width-4)*Cout)
        # 5 banded matrices stacked along K (one per kernel row).
        w = np.asarray(w, np.float32)
        cout, cin, k, _ = w.shape
        wo = width - k + 1
        mat = np.zeros((k * width * cin, wo * cout), np.float32)
        for i in range(k):                      # kernel row
            base = i * width * cin
            for x in range(wo):                 # output column
                for j in range(k):              # kernel column
                    r0 = base + (x + j) * cin
                    mat[r0:r0 + cin, x * cout:(x + 1) * cout] = w[:, :, i, j].T
        return jnp.asarray(mat)

    def pool_mat(width, c):
        # (width*c, (width//2)*c): averages adjacent column pairs per channel.
        m = np.zeros((width * c, (width // 2) * c), np.float32)
        for q in range(width // 2):
            for ch in range(c):
                m[(2 * q) * c + ch, q * c + ch] = 0.25
                m[(2 * q + 1) * c + ch, q * c + ch] = 0.25
        return jnp.asarray(m)

    def bias_row(b, wo):
        return jnp.asarray(np.tile(np.asarray(b, np.float32), wo)[None, :])

    # fc weights/bias zero-padded to 128 output lanes (lane-dense output store).
    fcw = np.zeros((120, 128), np.float32)
    fcw[:, :84] = np.asarray(p['fc_w'], np.float32).T
    fcb = np.zeros((1, 128), np.float32)
    fcb[0, :84] = np.asarray(p['fc_b'], np.float32)

    return {
        'c1m': conv_cat_mat(p['conv1_w'], 32), 'c1b': bias_row(p['conv1_b'], 28),
        'p1':  pool_mat(28, 6),
        'c2m': conv_cat_mat(p['conv2_w'], 14), 'c2b': bias_row(p['conv2_b'], 10),
        'p2':  pool_mat(10, 16),
        'c3m': conv_cat_mat(p['conv3_w'], 5),  'c3b': bias_row(p['conv3_b'], 1),
        'fcw': jnp.asarray(fcw),
        'fcb': jnp.asarray(fcb),
    }


# ---------------------------------------------------------------------------
# Forward wrapper: one pallas_call, batch tiled over a parallel grid
# ---------------------------------------------------------------------------
def lenet5_a_linear0(x, prep, block_n=128):
    """x: (N, 1, 32, 32) float32 -> (N, 84), matching LeNet5_A('linear0').

    block_n: images per grid step (multiple of 8). 128 is safe on v5e/v6e/v7x;
    on v6e/v5e (128 MiB VMEM) it can be raised to 256-512 for a bit more
    amortization.  Grid is marked "parallel" so v7x megacore shards steps.
    """
    n = x.shape[0]
    assert x.shape[1:] == (1, 32, 32), x.shape
    assert block_n % 8 == 0
    bn = n if n <= block_n else block_n
    x2d = x.astype(jnp.float32).reshape(n * 32, 32)   # rows=(image,row), cols=col

    def _full2d(a):
        return pl.BlockSpec(a.shape, lambda b: (0, 0))

    operands = (x2d, prep['c1m'], prep['c1b'], prep['p1'],
                prep['c2m'], prep['c2b'], prep['p2'],
                prep['c3m'], prep['c3b'], prep['fcw'], prep['fcb'])

    # Advisory cost estimate (per-image: ~0.84 MFLOP, ~6.5K tanh, ~4.6 KB I/O).
    weight_bytes = sum(int(np.prod(a.shape)) * 4 for a in operands[1:])
    cost = pl.CostEstimate(
        flops=n * 837_664,
        transcendentals=n * 6_508,
        bytes_accessed=n * (32 * 32 + 128) * 4 + weight_bytes)

    # Scoped VMEM: ~16 MiB base + ~128 KiB per image in the tile (<= ~48 MiB at
    # bn=256, under v7x's 64 MiB physical and v6e/v5e's 128 MiB).
    vmem_limit = min(100 * 2**20, 16 * 2**20 + bn * 128 * 1024)

    out = pl.pallas_call(
        _lenet_fused_kernel,
        out_shape=jax.ShapeDtypeStruct((n, 128), jnp.float32),
        grid_spec=pltpu.PrefetchScalarGridSpec(
            num_scalar_prefetch=0,
            grid=(pl.cdiv(n, bn),),
            in_specs=[pl.BlockSpec((bn * 32, 32), lambda b: (b, 0))]
                     + [_full2d(a) for a in operands[1:]],
            out_specs=pl.BlockSpec((bn, 128), lambda b: (b, 0)),
        ),
        compiler_params=pltpu.CompilerParams(
            dimension_semantics=("parallel",),
            vmem_limit_bytes=vmem_limit),
        cost_estimate=cost,
    )(*operands)
    return out[:, :84]


# ---------------------------------------------------------------------------
# Pure-JAX reference (correctness check only)
# ---------------------------------------------------------------------------
def reference(x, p):
    def conv(x, w, b):
        y = jax.lax.conv_general_dilated(
            x, w, (1, 1), 'VALID', dimension_numbers=('NCHW', 'OIHW', 'NCHW'))
        return jnp.tanh(y + b[None, :, None, None])

    def pool(x):
        n, c, h, w = x.shape
        return x.reshape(n, c, h // 2, 2, w // 2, 2).mean(axis=(3, 5))

    x = pool(conv(x, p['conv1_w'], p['conv1_b']))
    x = pool(conv(x, p['conv2_w'], p['conv2_b']))
    x = conv(x, p['conv3_w'], p['conv3_b'])
    x = x.reshape(x.shape[0], -1)
    return jnp.tanh(x @ p['fc_w'].T + p['fc_b'])


if __name__ == "__main__":
    key = jax.random.PRNGKey(0)
    ks = jax.random.split(key, 9)
    params = {
        'conv1_w': jax.random.normal(ks[0], (6, 1, 5, 5), jnp.float32) * 0.1,
        'conv1_b': jax.random.normal(ks[1], (6,), jnp.float32) * 0.1,
        'conv2_w': jax.random.normal(ks[2], (16, 6, 5, 5), jnp.float32) * 0.1,
        'conv2_b': jax.random.normal(ks[3], (16,), jnp.float32) * 0.1,
        'conv3_w': jax.random.normal(ks[4], (120, 16, 5, 5), jnp.float32) * 0.1,
        'conv3_b': jax.random.normal(ks[5], (120,), jnp.float32) * 0.1,
        'fc_w':    jax.random.normal(ks[6], (84, 120), jnp.float32) * 0.1,
        'fc_b':    jax.random.normal(ks[7], (84,), jnp.float32) * 0.1,
    }
    # Batch=2, 1 channel, 32x32 (required for the 'linear0' / full LeNet path).
    x = jax.random.normal(ks[8], (2, 1, 32, 32), jnp.float32)

    prep = prepare_params(params)          # one-time layout work, outside the kernel
    fwd = jax.jit(lenet5_a_linear0)

    out = jax.block_until_ready(fwd(x, prep))
    ref = jax.block_until_ready(reference(x, params))

    assert out.shape == (2, 84), out.shape
    assert out.dtype == jnp.float32
    assert jnp.allclose(out, ref, atol=1e-4, rtol=1e-4), \
        float(jnp.max(jnp.abs(out - ref)))
    print("KERNEL_OK")
</pallas_src>

<mosaic_0001>
module attributes {stable_mosaic.version = 11 : i64} {
  func.func @_lenet_fused_kernel(%arg0: i32, %arg1: memref<64x32xf32, #tpu.memory_space<vmem>>, %arg2: memref<160x168xf32, #tpu.memory_space<vmem>>, %arg3: memref<1x168xf32, #tpu.memory_space<vmem>>, %arg4: memref<168x84xf32, #tpu.memory_space<vmem>>, %arg5: memref<420x160xf32, #tpu.memory_space<vmem>>, %arg6: memref<1x160xf32, #tpu.memory_space<vmem>>, %arg7: memref<160x80xf32, #tpu.memory_space<vmem>>, %arg8: memref<400x120xf32, #tpu.memory_space<vmem>>, %arg9: memref<1x120xf32, #tpu.memory_space<vmem>>, %arg10: memref<120x128xf32, #tpu.memory_space<vmem>>, %arg11: memref<1x128xf32, #tpu.memory_space<vmem>>, %arg12: memref<2x128xf32, #tpu.memory_space<vmem>>) attributes {dimension_semantics = [#tpu.dimension_semantics<parallel>], iteration_bounds = array<i64: 1>, scalar_prefetch = 0 : i64, scratch_operands = 0 : i64, tpu.core_type = #tpu.core_type<tc>, window_params = [{transform_indices = @transform_0, window_bounds = array<i64: 64, 32>}, {pipeline_mode = #tpu.pipeline_mode<synchronous>, transform_indices = @transform_1, window_bounds = array<i64: 160, 168>}, {pipeline_mode = #tpu.pipeline_mode<synchronous>, transform_indices = @transform_2, window_bounds = array<i64: 1, 168>}, {pipeline_mode = #tpu.pipeline_mode<synchronous>, transform_indices = @transform_3, window_bounds = array<i64: 168, 84>}, {pipeline_mode = #tpu.pipeline_mode<synchronous>, transform_indices = @transform_4, window_bounds = array<i64: 420, 160>}, {pipeline_mode = #tpu.pipeline_mode<synchronous>, transform_indices = @transform_5, window_bounds = array<i64: 1, 160>}, {pipeline_mode = #tpu.pipeline_mode<synchronous>, transform_indices = @transform_6, window_bounds = array<i64: 160, 80>}, {pipeline_mode = #tpu.pipeline_mode<synchronous>, transform_indices = @transform_7, window_bounds = array<i64: 400, 120>}, {pipeline_mode = #tpu.pipeline_mode<synchronous>, transform_indices = @transform_8, window_bounds = array<i64: 1, 120>}, {pipeline_mode = #tpu.pipeline_mode<synchronous>, transform_indices = @transform_9, window_bounds = array<i64: 120, 128>}, {pipeline_mode = #tpu.pipeline_mode<synchronous>, transform_indices = @transform_10, window_bounds = array<i64: 1, 128>}, {transform_indices = @transform_11, window_bounds = array<i64: 2, 128>}]} {
    %c0 = arith.constant 0 : index
    %c0_0 = arith.constant 0 : index
    %0 = vector.load %arg1[%c0, %c0_0] : memref<64x32xf32, #tpu.memory_space<vmem>>, vector<64x32xf32>
    %1 = vector.shape_cast %0 : vector<64x32xf32> to vector<2x32x32xf32>
    %2 = vector.extract_strided_slice %1 {offsets = [0, 0, 0], sizes = [2, 28, 32], strides = [1, 1, 1]} : vector<2x32x32xf32> to vector<2x28x32xf32>
    %3 = vector.extract_strided_slice %1 {offsets = [0, 1, 0], sizes = [2, 28, 32], strides = [1, 1, 1]} : vector<2x32x32xf32> to vector<2x28x32xf32>
    %4 = vector.extract_strided_slice %1 {offsets = [0, 2, 0], sizes = [2, 28, 32], strides = [1, 1, 1]} : vector<2x32x32xf32> to vector<2x28x32xf32>
    %5 = vector.extract_strided_slice %1 {offsets = [0, 3, 0], sizes = [2, 28, 32], strides = [1, 1, 1]} : vector<2x32x32xf32> to vector<2x28x32xf32>
    %6 = vector.extract_strided_slice %1 {offsets = [0, 4, 0], sizes = [2, 28, 32], strides = [1, 1, 1]} : vector<2x32x32xf32> to vector<2x28x32xf32>
    %7 = tpu.concatenate %2, %3, %4, %5, %6 in 2 : vector<2x28x32xf32>, vector<2x28x32xf32>, vector<2x28x32xf32>, vector<2x28x32xf32>, vector<2x28x32xf32> -> vector<2x28x160xf32>
    %8 = vector.shape_cast %7 : vector<2x28x160xf32> to vector<56x160xf32>
    %c0_1 = arith.constant 0 : index
    %c0_2 = arith.constant 0 : index
    %9 = vector.load %arg2[%c0_1, %c0_2] : memref<160x168xf32, #tpu.memory_space<vmem>>, vector<160x168xf32>
    %cst = arith.constant dense<0.000000e+00> : vector<56x168xf32>
    %10 = tpu.matmul %8, %9, %cst {dimension_numbers = #tpu.dot_dimension_numbers<[1], [0], [0], [1], [0, 0, 1, 1], [], []>} : vector<56x160xf32>, vector<160x168xf32>, vector<56x168xf32> -> vector<56x168xf32>
    %c0_3 = arith.constant 0 : index
    %c0_4 = arith.constant 0 : index
    %11 = vector.load %arg3[%c0_3, %c0_4] : memref<1x168xf32, #tpu.memory_space<vmem>>, vector<1x168xf32>
    %12 = vector.broadcast %11 : vector<1x168xf32> to vector<56x168xf32>
    %13 = arith.addf %10, %12 : vector<56x168xf32>
    %14 = math.tanh %13 : vector<56x168xf32>
    %15 = vector.shape_cast %14 : vector<56x168xf32> to vector<28x2x168xf32>
    %16 = vector.extract_strided_slice %15 {offsets = [0, 0, 0], sizes = [28, 1, 168], strides = [1, 1, 1]} : vector<28x2x168xf32> to vector<28x1x168xf32>
    %17 = vector.shape_cast %16 : vector<28x1x168xf32> to vector<28x168xf32>
    %18 = vector.extract_strided_slice %15 {offsets = [0, 1, 0], sizes = [28, 1, 168], strides = [1, 1, 1]} : vector<28x2x168xf32> to vector<28x1x168xf32>
    %19 = vector.shape_cast %18 : vector<28x1x168xf32> to vector<28x168xf32>
    %20 = arith.addf %17, %19 : vector<28x168xf32>
    %c0_5 = arith.constant 0 : index
    %c0_6 = arith.constant 0 : index
    %21 = vector.load %arg4[%c0_5, %c0_6] : memref<168x84xf32, #tpu.memory_space<vmem>>, vector<168x84xf32>
    %cst_7 = arith.constant dense<0.000000e+00> : vector<28x84xf32>
    %22 = tpu.matmul %20, %21, %cst_7 {dimension_numbers = #tpu.dot_dimension_numbers<[1], [0], [0], [1], [0, 0, 1, 1], [], []>} : vector<28x168xf32>, vector<168x84xf32>, vector<28x84xf32> -> vector<28x84xf32>
    %23 = vector.shape_cast %22 : vector<28x84xf32> to vector<2x14x84xf32>
    %24 = vector.extract_strided_slice %23 {offsets = [0, 0, 0], sizes = [2, 10, 84], strides = [1, 1, 1]} : vector<2x14x84xf32> to vector<2x10x84xf32>
    %25 = vector.extract_strided_slice %23 {offsets = [0, 1, 0], sizes = [2, 10, 84], strides = [1, 1, 1]} : vector<2x14x84xf32> to vector<2x10x84xf32>
    %26 = vector.extract_strided_slice %23 {offsets = [0, 2, 0], sizes = [2, 10, 84], strides = [1, 1, 1]} : vector<2x14x84xf32> to vector<2x10x84xf32>
    %27 = vector.extract_strided_slice %23 {offsets = [0, 3, 0], sizes = [2, 10, 84], strides = [1, 1, 1]} : vector<2x14x84xf32> to vector<2x10x84xf32>
    %28 = vector.extract_strided_slice %23 {offsets = [0, 4, 0], sizes = [2, 10, 84], strides = [1, 1, 1]} : vector<2x14x84xf32> to vector<2x10x84xf32>
    %29 = tpu.concatenate %24, %25, %26, %27, %28 in 2 : vector<2x10x84xf32>, vector<2x10x84xf32>, vector<2x10x84xf32>, vector<2x10x84xf32>, vector<2x10x84xf32> -> vector<2x10x420xf32>
    %30 = vector.shape_cast %29 : vector<2x10x420xf32> to vector<20x420xf32>
    %c0_8 = arith.constant 0 : index
    %c0_9 = arith.constant 0 : index
    %31 = vector.load %arg5[%c0_8, %c0_9] : memref<420x160xf32, #tpu.memory_space<vmem>>, vector<420x160xf32>
    %cst_10 = arith.constant dense<0.000000e+00> : vector<20x160xf32>
    %32 = tpu.matmul %30, %31, %cst_10 {dimension_numbers = #tpu.dot_dimension_numbers<[1], [0], [0], [1], [0, 0, 1, 1], [], []>} : vector<20x420xf32>, vector<420x160xf32>, vector<20x160xf32> -> vector<20x160xf32>
    %c0_11 = arith.constant 0 : index
    %c0_12 = arith.constant 0 : index
    %33 = vector.load %arg6[%c0_11, %c0_12] : memref<1x160xf32, #tpu.memory_space<vmem>>, vector<1x160xf32>
    %34 = vector.broadcast %33 : vector<1x160xf32> to vector<20x160xf32>
    %35 = arith.addf %32, %34 : vector<20x160xf32>
    %36 = math.tanh %35 : vector<20x160xf32>
    %37 = vector.shape_cast %36 : vector<20x160xf32> to vector<10x2x160xf32>
    %38 = vector.extract_strided_slice %37 {offsets = [0, 0, 0], sizes = [10, 1, 160], strides = [1, 1, 1]} : vector<10x2x160xf32> to vector<10x1x160xf32>
    %39 = vector.shape_cast %38 : vector<10x1x160xf32> to vector<10x160xf32>
    %40 = vector.extract_strided_slice %37 {offsets = [0, 1, 0], sizes = [10, 1, 160], strides = [1, 1, 1]} : vector<10x2x160xf32> to vector<10x1x160xf32>
    %41 = vector.shape_cast %40 : vector<10x1x160xf32> to vector<10x160xf32>
    %42 = arith.addf %39, %41 : vector<10x160xf32>
    %c0_13 = arith.constant 0 : index
    %c0_14 = arith.constant 0 : index
    %43 = vector.load %arg7[%c0_13, %c0_14] : memref<160x80xf32, #tpu.memory_space<vmem>>, vector<160x80xf32>
    %cst_15 = arith.constant dense<0.000000e+00> : vector<10x80xf32>
    %44 = tpu.matmul %42, %43, %cst_15 {dimension_numbers = #tpu.dot_dimension_numbers<[1], [0], [0], [1], [0, 0, 1, 1], [], []>} : vector<10x160xf32>, vector<160x80xf32>, vector<10x80xf32> -> vector<10x80xf32>
    %45 = vector.shape_cast %44 : vector<10x80xf32> to vector<2x5x80xf32>
    %46 = vector.extract_strided_slice %45 {offsets = [0, 0, 0], sizes = [2, 1, 80], strides = [1, 1, 1]} : vector<2x5x80xf32> to vector<2x1x80xf32>
    %47 = vector.extract_strided_slice %45 {offsets = [0, 1, 0], sizes = [2, 1, 80], strides = [1, 1, 1]} : vector<2x5x80xf32> to vector<2x1x80xf32>
    %48 = vector.extract_strided_slice %45 {offsets = [0, 2, 0], sizes = [2, 1, 80], strides = [1, 1, 1]} : vector<2x5x80xf32> to vector<2x1x80xf32>
    %49 = vector.extract_strided_slice %45 {offsets = [0, 3, 0], sizes = [2, 1, 80], strides = [1, 1, 1]} : vector<2x5x80xf32> to vector<2x1x80xf32>
    %50 = vector.extract_strided_slice %45 {offsets = [0, 4, 0], sizes = [2, 1, 80], strides = [1, 1, 1]} : vector<2x5x80xf32> to vector<2x1x80xf32>
    %51 = tpu.concatenate %46, %47, %48, %49, %50 in 2 : vector<2x1x80xf32>, vector<2x1x80xf32>, vector<2x1x80xf32>, vector<2x1x80xf32>, vector<2x1x80xf32> -> vector<2x1x400xf32>
    %52 = vector.shape_cast %51 : vector<2x1x400xf32> to vector<2x400xf32>
    %c0_16 = arith.constant 0 : index
    %c0_17 = arith.constant 0 : index
    %53 = vector.load %arg8[%c0_16, %c0_17] : memref<400x120xf32, #tpu.memory_space<vmem>>, vector<400x120xf32>
    %cst_18 = arith.constant dense<0.000000e+00> : vector<2x120xf32>
    %54 = tpu.matmul %52, %53, %cst_18 {dimension_numbers = #tpu.dot_dimension_numbers<[1], [0], [0], [1], [0, 0, 1, 1], [], []>} : vector<2x400xf32>, vector<400x120xf32>, vector<2x120xf32> -> vector<2x120xf32>
    %c0_19 = arith.constant 0 : index
    %c0_20 = arith.constant 0 : index
    %55 = vector.load %arg9[%c0_19, %c0_20] : memref<1x120xf32, #tpu.memory_space<vmem>>, vector<1x120xf32>
    %56 = vector.broadcast %55 : vector<1x120xf32> to vector<2x120xf32>
    %57 = arith.addf %54, %56 : vector<2x120xf32>
    %58 = math.tanh %57 : vector<2x120xf32>
    %c0_21 = arith.constant 0 : index
    %c0_22 = arith.constant 0 : index
    %59 = vector.load %arg10[%c0_21, %c0_22] : memref<120x128xf32, #tpu.memory_space<vmem>>, vector<120x128xf32>
    %cst_23 = arith.constant dense<0.000000e+00> : vector<2x128xf32>
    %60 = tpu.matmul %58, %59, %cst_23 {dimension_numbers = #tpu.dot_dimension_numbers<[1], [0], [0], [1], [0, 0, 1, 1], [], []>} : vector<2x120xf32>, vector<120x128xf32>, vector<2x128xf32> -> vector<2x128xf32>
    %c0_24 = arith.constant 0 : index
    %c0_25 = arith.constant 0 : index
    %61 = vector.load %arg11[%c0_24, %c0_25] : memref<1x128xf32, #tpu.memory_space<vmem>>, vector<1x128xf32>
    %62 = vector.broadcast %61 : vector<1x128xf32> to vector<2x128xf32>
    %63 = arith.addf %60, %62 : vector<2x128xf32>
    %64 = math.tanh %63 : vector<2x128xf32>
    %c0_26 = arith.constant 0 : index
    %c0_27 = arith.constant 0 : index
    %65 = vector.load %arg12[%c0_26, %c0_27] : memref<2x128xf32, #tpu.memory_space<vmem>>, vector<2x128xf32>
    tpu.vector_store %arg12[%c0_26, %c0_27], %64 {strides = array<i32>} : memref<2x128xf32, #tpu.memory_space<vmem>>, vector<2x128xf32>,
    return
  }
  func.func @transform_0(%arg0: i32) -> (i32, i32) {
    %c0_i32 = arith.constant 0 : i32
    %c0_i32_0 = arith.constant 0 : i32
    return %arg0, %c0_i32 : i32, i32
  }
  func.func @transform_1(%arg0: i32) -> (i32, i32) {
    %c0_i32 = arith.constant 0 : i32
    %c0_i32_0 = arith.constant 0 : i32
    %c0_i32_1 = arith.constant 0 : i32
    return %c0_i32, %c0_i32_0 : i32, i32
  }
  func.func @transform_2(%arg0: i32) -> (i32, i32) {
    %c0_i32 = arith.constant 0 : i32
    %c0_i32_0 = arith.constant 0 : i32
    %c0_i32_1 = arith.constant 0 : i32
    return %c0_i32, %c0_i32_0 : i32, i32
  }
  func.func @transform_3(%arg0: i32) -> (i32, i32) {
    %c0_i32 = arith.constant 0 : i32
    %c0_i32_0 = arith.constant 0 : i32
    %c0_i32_1 = arith.constant 0 : i32
    return %c0_i32, %c0_i32_0 : i32, i32
  }
  func.func @transform_4(%arg0: i32) -> (i32, i32) {
    %c0_i32 = arith.constant 0 : i32
    %c0_i32_0 = arith.constant 0 : i32
    %c0_i32_1 = arith.constant 0 : i32
    return %c0_i32, %c0_i32_0 : i32, i32
  }
  func.func @transform_5(%arg0: i32) -> (i32, i32) {
    %c0_i32 = arith.constant 0 : i32
    %c0_i32_0 = arith.constant 0 : i32
    %c0_i32_1 = arith.constant 0 : i32
    return %c0_i32, %c0_i32_0 : i32, i32
  }
  func.func @transform_6(%arg0: i32) -> (i32, i32) {
    %c0_i32 = arith.constant 0 : i32
    %c0_i32_0 = arith.constant 0 : i32
    %c0_i32_1 = arith.constant 0 : i32
    return %c0_i32, %c0_i32_0 : i32, i32
  }
  func.func @transform_7(%arg0: i32) -> (i32, i32) {
    %c0_i32 = arith.constant 0 : i32
    %c0_i32_0 = arith.constant 0 : i32
    %c0_i32_1 = arith.constant 0 : i32
    return %c0_i32, %c0_i32_0 : i32, i32
  }
  func.func @transform_8(%arg0: i32) -> (i32, i32) {
    %c0_i32 = arith.constant 0 : i32
    %c0_i32_0 = arith.constant 0 : i32
    %c0_i32_1 = arith.constant 0 : i32
    return %c0_i32, %c0_i32_0 : i32, i32
  }
  func.func @transform_9(%arg0: i32) -> (i32, i32) {
    %c0_i32 = arith.constant 0 : i32
    %c0_i32_0 = arith.constant 0 : i32
    %c0_i32_1 = arith.constant 0 : i32
    return %c0_i32, %c0_i32_0 : i32, i32
  }
  func.func @transform_10(%arg0: i32) -> (i32, i32) {
    %c0_i32 = arith.constant 0 : i32
    %c0_i32_0 = arith.constant 0 : i32
    %c0_i32_1 = arith.constant 0 : i32
    return %c0_i32, %c0_i32_0 : i32, i32
  }
  func.func @transform_11(%arg0: i32) -> (i32, i32) {
    %c0_i32 = arith.constant 0 : i32
    %c0_i32_0 = arith.constant 0 : i32
    return %arg0, %c0_i32 : i32, i32
  }
}

</mosaic_0001>

<bundles_post_ra>
// kernel: lenet5_a_linear0.1
= control target key start
LH: loop header
LB: loop body
LE: loop exit
PB: predicated region body
PF: predicated region fallthrough
CT: control target
= control target key end

     0   :  { %vm133_vm0 = vcmask 1044480   ;;  %vm55_vm1 = vcmask 1046528   ;;  %vm94_vm2 = vcmask 1045504   ;;  %s3299_s25 = smov 96   ;;  %s3300_s26 = smov 32   ;;  %vm172_vm3 = vcmask 1043456   ;;  %s4821_s0 = inlined_call_operand.vmem [shape: f32[64,32], index: 0, kind: input, shape index: {}]   ;;  %s4822_s1 = inlined_call_operand.vmem [shape: f32[160,168], index: 1, kind: input, shape index: {}]   ;;  %s4823_s2 = inlined_call_operand.vmem [shape: f32[1,168], index: 2, kind: input, shape index: {}]   ;;  %s4824_s3 = inlined_call_operand.vmem [shape: f32[168,84], index: 3, kind: input, shape index: {}]   ;;  %s4825_s4 = inlined_call_operand.vmem [shape: f32[420,160], index: 4, kind: input, shape index: {}]   ;;  %s4826_s5 = inlined_call_operand.vmem [shape: f32[1,160], index: 5, kind: input, shape index: {}]   ;;  %s4827_s6 = inlined_call_operand.vmem [shape: f32[160,80], index: 6, kind: input, shape index: {}]   ;;  %s4828_s7 = inlined_call_operand.vmem [shape: f32[400,120], index: 7, kind: input, shape index: {}]   ;;  %s4829_s8 = inlined_call_operand.vmem [shape: f32[1,120], index: 8, kind: input, shape index: {}]   ;;  %s4830_s9 = inlined_call_operand.vmem [shape: f32[120,128], index: 9, kind: input, shape index: {}]   ;;  %s4831_s10 = inlined_call_operand.vmem [shape: f32[1,128], index: 10, kind: input, shape index: {}]   ;;  %s4832_s11 = inlined_call_operand.hbm [shape: f32[2,128], index: 11, kind: output, shape index: {}]  }
   0x1   :  { %v3376_v0 = vld [vmem:[%s4821_s0] sm:$0xff]  ;;  %v3381_v1 = vld [vmem:[%s4821_s0 + $0x8] sm:$0xff]  ;;  %v3386_v2 = vld [vmem:[%s4821_s0 + $0x10] sm:$0xff]  ;;  %s3301_s24 = smov 64  }
   0x2   :  { %v134_v3 = vrot.slane %v3376_v0, 3  ;;  %v135_v4 = vrot.slane %v3381_v1, 3  ;;  %v137_v5 = vrot.slane %v3386_v2, 3  ;;  %v56_v6 = vrot.slane %v3376_v0, 1  ;;  %v3395_v7 = vld [vmem:[%s4821_s0 + $0x18] sm:$0xff]  ;;  %v3416_v25 = vld [vmem:[%s4821_s0 + $0x20] sm:$0xff] }
   0x3   :  { %v57_v8 = vrot.slane %v3381_v1, 1  ;;  %v59_v9 = vrot.slane %v3386_v2, 1  ;;  %v61_v10 = vrot.slane %v3395_v7, 1  ;;  %v95_v13 = vrot.slane %v3376_v0, 2  ;;  %v237_v26 = vld [vmem:[%s4822_s1 + $0x8] sm:$0xff]  ;;  %v239_v27 = vld [vmem:[%s4822_s1 + $0x18] sm:$0xff] }
   0x4   :  { %v136_v11 = vsel %vm133_vm0, %v134_v3, %v135_v4  ;;  %v138_v12 = vsel %vm133_vm0, %v135_v4, %v137_v5  ;;  %v96_v14 = vrot.slane %v3381_v1, 2  ;;  %v98_v20 = vrot.slane %v3386_v2, 2  ;;  %v3427_v28 = vld [vmem:[%s4821_s0 + $0x28] sm:$0xff]  ;;  %v236_v29 = vld [vmem:[%s4822_s1] sm:$0xff]  ;;  %v238_v30 = vld [vmem:[%s4822_s1 + $0x10] sm:$0xff] }
   0x5   :  { %v3216_v15 = vpack.i.bf16 %v138_v12, %v136_v11  ;;  %v58_v16 = vsel %vm55_vm1, %v56_v6, %v57_v8  ;;  %v60_v17 = vsel %vm55_vm1, %v57_v8, %v59_v9  ;;  %v62_v21 = vsel %vm55_vm1, %v59_v9, %v61_v10  ;;  %v241_v31 = vld [vmem:[%s4822_s1 + $0x28] sm:$0xff]  ;;  %v243_v32 = vld [vmem:[%s4822_s1 + $0x38] sm:$0xff]  ;;  %v240_v35 = vld [vmem:[%s4822_s1 + $0x20] sm:$0xff] }
   0x6   :  { %v3206_v18 = vpack.i.bf16 %v60_v17, %v58_v16  ;;  %v97_v19 = vsel %vm94_vm2, %v95_v13, %v96_v14  ;;  %v99_v22 = vsel %vm94_vm2, %v96_v14, %v98_v20  ;;  %v100_v24 = vrot.slane %v3395_v7, 2  ;;  %v242_v36 = vld [vmem:[%s4822_s1 + $0x30] sm:$0xff]  ;;  %v245_v41 = vld [vmem:[%s4822_s1 + $0x48] sm:$0xff]  ;;  %v247_v42 = vld [vmem:[%s4822_s1 + $0x58] sm:$0xff] }
   0x7   :  { %3217 = vrot.lane.b32.xlu1 %v3216_v15, %s3299_s25  ;;  %v3211_v23 = vpack.i.bf16 %v99_v22, %v97_v19  ;;  %v139_v33 = vrot.slane %v3395_v7, 3  ;;  %v2896_v34 = vpack.c.bf16 %v239_v27, %v237_v26  ;;  %v63_v38 = vrot.slane %v3416_v25, 1  ;;  %v244_v49 = vld [vmem:[%s4822_s1 + $0x40] sm:$0xff]  ;;  %v246_v50 = vld [vmem:[%s4822_s1 + $0x50] sm:$0xff]  ;;  %v249_v52 = vld [vmem:[%s4822_s1 + $0x68] sm:$0xff] }
   0x8   :  { %3207 = vrot.lane.b32.xlu0 %v3206_v18, %s3300_s26  ;;  %v101_v37 = vsel %vm94_vm2, %v98_v20, %v100_v24  ;;  %v64_v39 = vrot.slane %v3427_v28, 1  ;;  %v2898_v40 = vpack.c.bf16 %v238_v30, %v236_v29  ;;  %v2900_v43 = vpack.c.bf16 %v243_v32, %v241_v31  ;;  %v251_v53 = vld [vmem:[%s4822_s1 + $0x78] sm:$0xff] }
   0x9   :  { %2897 = vmatprep.subr.bf16.mxu0 %v2896_v34  ;;  %v2902_v44 = vpack.c.bf16 %v242_v36, %v240_v35  ;;  %v140_v45 = vsel %vm133_vm0, %v137_v5, %v139_v33  ;;  %v102_v46 = vrot.slane %v3416_v25, 2  ;;  %v103_v47 = vrot.slane %v3427_v28, 2 }
   0xa   :  { %2899 = vmatpush1.bf16.msra.mxu0 %v2898_v40  ;;  %v2904_v48 = vpack.c.bf16 %v247_v42, %v245_v41  ;;  %v65_v51 = vsel %vm55_vm1, %v63_v38, %v64_v39  ;;  %v173_v54 = vrot.slane %v3376_v0, 4 }
   0xb   :  { %74 = vrot.lane.b32.xlu1 %v62_v21, %s3300_s26  ;;  %2901 = vmatprep.subr.bf16.mxu0 %v2900_v43 }
   0xc   :  { %3212 = vrot.lane.b32.xlu0 %v3211_v23, %s3301_s24 }
   0xf   :  { %76 = vrot.lane.b32.xlu1 %v61_v10, %s3300_s26 }
  0x10   :  { %113 = vrot.lane.b32.xlu0 %v101_v37, %s3301_s24 }
  0x11   :  { %16 = vsyncpa [#allocation3], 0  ;;  %2903 = vmatpush1.bf16.msra.mxu0 %v2902_v44  ;;  %v2906_v55 = vpack.c.bf16 %v246_v50, %v244_v49  ;;  %v174_v56 = vrot.slane %v3381_v1, 4  ;;  %v104_v57 = vsel %vm94_vm2, %v102_v46, %v103_v47  ;;  %v141_v58 = vrot.slane %v3416_v25, 3  ;;  %v248_v61 = vld [vmem:[%s4822_s1 + $0x60] sm:$0xff]  ;;  %v250_v62 = vld [vmem:[%s4822_s1 + $0x70] sm:$0xff] }
  0x12   :  { %v142_v59 = vrot.slane %v3427_v28, 3  ;;  %2905 = vmatprep.subr.bf16.mxu0 %v2904_v48  ;;  %v2908_v60 = vpack.c.bf16 %v251_v53, %v249_v52  ;;  %v3497_v63 = vld [vmem:[%s4821_s0 + $0x30] sm:$0xff]  ;;  %v253_v3 = vld [vmem:[%s4822_s1 + $0x88] sm:$0xff]  ;;  %v255_v4 = vld [vmem:[%s4822_s1 + $0x98] sm:$0xff]  ;;  %vm187_vm4 = vcmask 261120   ;;  %v2910_v6 = vpack.c.bf16 %v250_v62, %v248_v61  ;;  %s3305_s19 = smov 40  }
  0x13   :  { %152 = vrot.lane.b32.xlu1 %v140_v45, %s3299_s25  ;;  %v175_v5 = vsel %vm172_vm3, %v173_v54, %v174_v56  ;;  %v105_v9 = vrot.slane %v3497_v63, 2  ;;  %v2912_v10 = vpack.c.bf16 %v255_v4, %v253_v3  ;;  %v252_v11 = vld [vmem:[%s4822_s1 + $0x80] sm:$0xff]  ;;  %v254_v12 = vld [vmem:[%s4822_s1 + $0x90] sm:$0xff]  ;;  %v66_v13 = vrot.slane %v3497_v63, 1  ;;  %v3523_v14 = vld [vmem:[%s4821_s0 + $0x38] sm:$0xff]  ;;  %s3306_s20 = smov 84  }
  0x14   :  { %78 = vrot.lane.b32.xlu0 %v65_v51, %s3300_s26  ;;  %2746 = vmatprep.mubr.msk.f32.mxu0 %vm187_vm4, %v175_v5  ;;  %v143_v8 = vsel %vm133_vm0, %v141_v58, %v142_v59  ;;  %v257_v15 = vld [vmem:[%s4822_s1 + $0xa8] sm:$0xff]  ;;  %v259_v16 = vld [vmem:[%s4822_s1 + $0xb8] sm:$0xff]  ;;  %v2914_v17 = vpack.c.bf16 %v254_v12, %v252_v11  ;;  %v68_v19 = vrot.slane %v3523_v14, 1  ;;  %v256_v21 = vld [vmem:[%s4822_s1 + $0xa0] sm:$0xff]  ;;  %v146_v31 = vrot.slane %v3523_v14, 3  ;;  %s3307_s23 = smov 124  }
  0x15   :  { %2907 = vmatpush1.bf16.msra.mxu0 %v2906_v55  ;;  %v106_v18 = vsel %vm94_vm2, %v103_v47, %v105_v9  ;;  %v2916_v20 = vpack.c.bf16 %v259_v16, %v257_v15  ;;  %v258_v22 = vld [vmem:[%s4822_s1 + $0xb0] sm:$0xff]  ;;  %v67_v23 = vsel %vm55_vm1, %v64_v39, %v66_v13  ;;  %v261_v26 = vld [vmem:[%s4822_s1 + $0xc8] sm:$0xff]  ;;  %v263_v27 = vld [vmem:[%s4822_s1 + $0xd8] sm:$0xff]  ;;  %v107_v36 = vrot.slane %v3523_v14, 2  ;;  %s3308_s27 = smov 80  }
  0x16   :  { %2909 = vmatprep.subr.bf16.mxu0 %v2908_v60  ;;  %v2918_v29 = vpack.c.bf16 %v258_v22, %v256_v21  ;;  %v69_v30 = vsel %vm55_vm1, %v66_v13, %v68_v19  ;;  %v2920_v32 = vpack.c.bf16 %v263_v27, %v261_v26  ;;  %v262_v34 = vld [vmem:[%s4822_s1 + $0xd0] sm:$0xff]  ;;  %v265_v37 = vld [vmem:[%s4822_s1 + $0xe8] sm:$0xff]  ;;  %v267_v38 = vld [vmem:[%s4822_s1 + $0xf8] sm:$0xff]  ;;  %v3302_v55 = vmov 0.0|0.0  }
  0x17   :  { %117 = vrot.lane.b32.xlu1 %v104_v57, %s3301_s24  ;;  %v2924_v41 = vpack.c.bf16 %v267_v38, %v265_v37  ;;  %v264_v42 = vld [vmem:[%s4822_s1 + $0xe0] sm:$0xff]  ;;  %v266_v43 = vld [vmem:[%s4822_s1 + $0xf0] sm:$0xff]  ;;  %v108_v44 = vsel %vm94_vm2, %v105_v9, %v107_v36  ;;  %v269_v45 = vld [vmem:[%s4822_s1 + $0x108] sm:$0xff]  ;;  %2936 = vmatprep.subr.bf16.mxu1 %v3302_v55  ;;  %v176_v11 = vrot.slane %v3386_v2, 4  ;;  %vm196_vm5 = vcmask 523264  }
  0x18   :  { %115 = vrot.lane.b32.xlu0 %v100_v24, %s3301_s24  ;;  %v144_v24 = vrot.slane %v3497_v63, 3  ;;  %v271_v46 = vld [vmem:[%s4822_s1 + $0x118] sm:$0xff]  ;;  %v2926_v47 = vpack.c.bf16 %v266_v43, %v264_v42  ;;  %v268_v49 = vld [vmem:[%s4822_s1 + $0x100] sm:$0xff]  ;;  %v270_v50 = vld [vmem:[%s4822_s1 + $0x110] sm:$0xff]  ;;  %vm205_vm6 = vcmask 785408   ;;  %vm997_vm7 = vcmask 1041409  }
  0x19   :  { %2911 = vmatpush1.bf16.msra.mxu0 %v2910_v6  ;;  %v2928_v48 = vpack.c.bf16 %v271_v46, %v269_v45  ;;  %v273_v51 = vld [vmem:[%s4822_s1 + $0x128] sm:$0xff]  ;;  %v275_v52 = vld [vmem:[%s4822_s1 + $0x138] sm:$0xff]  ;;  %v724_v53 = vld [vmem:[%s4824_s3] sm:$0xff]  ;;  %v2930_v60 = vpack.c.bf16 %v270_v50, %v268_v49  ;;  %v177_v22 = vsel %vm172_vm3, %v174_v56, %v176_v11  ;;  %v183_v49 = vrot.slane %v3497_v63, 4 }
  0x1a   :  { %2913 = vmatprep.subr.bf16.mxu0 %v2912_v10  ;;  %v145_v35 = vsel %vm133_vm0, %v142_v59, %v144_v24  ;;  %v147_v40 = vsel %vm133_vm0, %v144_v24, %v146_v31  ;;  %v725_v54 = vld [vmem:[%s4824_s3 + $0x8] sm:$0xff]  ;;  %v726_v58 = vld [vmem:[%s4824_s3 + $0x10] sm:$0xff]  ;;  %v727_v59 = vld [vmem:[%s4824_s3 + $0x18] sm:$0xff]  ;;  %v2932_v61 = vpack.c.bf16 %v275_v52, %v273_v51  ;;  %v181_v24 = vrot.slane %v3427_v28, 4 }
  0x1b   :  { %156 = vrot.lane.b32.xlu1 %v143_v8, %s3299_s25  ;;  %v2937_v57 = vpack.c.bf16 %v725_v54, %v724_v53  ;;  %v272_v62 = vld [vmem:[%s4822_s1 + $0x120] sm:$0xff]  ;;  %v274_v3 = vld [vmem:[%s4822_s1 + $0x130] sm:$0xff]  ;;  %v2940_v4 = vpack.c.bf16 %v727_v59, %v726_v58  ;;  %v185_v54 = vrot.slane %v3523_v14, 4  ;;  %vm999_vm8 = vcmask 1042434  }
  0x1c   :  { %154 = vrot.lane.b32.xlu0 %v139_v33, %s3299_s25  ;;  %v260_v33 = vld [vmem:[%s4822_s1 + $0xc0] sm:$0xff]  ;;  %v2934_v5 = vpack.c.bf16 %v274_v3, %v272_v62  ;;  %v184_v51 = vsel %vm172_vm3, %v181_v24, %v183_v49  ;;  %vm1001_vm9 = vcmask 1043459   ;;  %vm1003_vm10 = vcmask 1044484   ;;  %s3310_s1 = smov 112  }
  0x1d   :  { %2915 = vmatpush1.bf16.msra.mxu0 %v2914_v17  ;;  %v2922_v39 = vpack.c.bf16 %v262_v34, %v260_v33  ;;  %2938 = vmatpush1.bf16.msra.mxu1 %v2937_v57  ;;  %vm1005_vm11 = vcmask 1045509   ;;  %vm1007_vm12 = vcmask 1046534   ;;  %vm1009_vm13 = vcmask 1047559  }
  0x1e   :  { %2917 = vmatprep.subr.bf16.mxu0 %v2916_v20  ;;  %2939 = vmatprep.subr.bf16.mxu1 %v3302_v55  ;;  %vm1056_vm14 = vcmask 326656   ;;  %vm1421_vm15 = vcmask 687104   ;;  %vm1430_vm0 = vcmask 1014784   ;;  %vm1775_vm2 = vcmask 293888  }
  0x1f   :  { %119 = vrot.lane.b32.xlu1 %v106_v18, %s3301_s24 }
  0x20   :  { %80 = vrot.lane.b32.xlu0 %v67_v23, %s3300_s26  ;;  %v180_v23 = vrot.slane %v3416_v25, 4 }
  0x21   :  { %2919 = vmatpush1.bf16.msra.mxu0 %v2918_v29  ;;  %2941 = vmatpush1.bf16.msra.mxu1 %v2940_v4 }
  0x22   :  { %2921 = vmatprep.subr.bf16.mxu0 %v2920_v32  ;;  %2942 = vmatprep.subr.bf16.mxu1 %v3302_v55  ;;  %v182_v56 = vsel %vm172_vm3, %v180_v23, %v181_v24  ;;  %v730_v24 = vld [vmem:[%s4824_s3 + $0x30] sm:$0xff] }
  0x23   :  { %82 = vrot.lane.b32.xlu1 %v69_v30, %s3300_s26 }
  0x24   :  { %158 = vrot.lane.b32.xlu0 %v145_v35, %s3299_s25 }
  0x25   :  { %2923 = vmatpush1.bf16.msra.mxu0 %v2922_v39 }
  0x26   :  { %2925 = vmatprep.subr.bf16.mxu0 %v2924_v41 }
  0x27   :  { %160 = vrot.lane.b32.xlu1 %v147_v40, %s3299_s25 }
  0x28   :  { %121 = vrot.lane.b32.xlu0 %v108_v44, %s3301_s24 }
  0x29   :  { %2927 = vmatpush1.bf16.msra.mxu0 %v2926_v47 }
  0x2a   :  { %2929 = vmatprep.subr.bf16.mxu0 %v2928_v48 }
  0x2b   :  { %123 = vrot.lane.b32.xlu1 %v107_v36, %s3301_s24 }
  0x2c   :  { %84 = vrot.lane.b32.xlu0 %v68_v19, %s3300_s26  ;;  %v178_v19 = vrot.slane %v3395_v7, 4 }
  0x2d   :  { %2931 = vmatpush1.bf16.msra.mxu0 %v2930_v60 }
  0x2e   :  { %2933 = vmatprep.subr.bf16.mxu0 %v2932_v61  ;;  %v179_v32 = vsel %vm172_vm3, %v176_v11, %v178_v19 }
  0x30   :  { %162 = vrot.lane.b32.xlu0 %v146_v31, %s3299_s25 }
  0x31   :  { %2935 = vmatpush1.bf16.msra.mxu0 %v2934_v5 }
  0x79   :  { %v3218_v6 = vpop.permute.xlu1 %3217 }
  0x7a   :  { %v3208_v8 = vpop.permute.xlu0 %3207  ;;  %v3219_v17 = vunpack.i.l.bf16 %v3218_v6  ;;  %v3220_v30 = vunpack.i.h.bf16 %v3218_v6 }
  0x7b   :  { %v3209_v9 = vunpack.i.l.bf16 %v3208_v8  ;;  %v3210_v12 = vunpack.i.h.bf16 %v3208_v8 }
  0x7d   :  { %v75_v10 = vpop.permute.xlu1 %74  ;;  %v188_v18 = vsel %vm187_vm4, %v3376_v0, %v3209_v9  ;;  %v189_v29 = vsel %vm187_vm4, %v3381_v1, %v3210_v12  ;;  %v2739_v1 = vcombine.low %v178_v19, %v182_v56 }
  0x7e   :  { %v3213_v13 = vpop.permute.xlu0 %3212  ;;  %v190_v35 = vsel %vm187_vm4, %v3386_v2, %v75_v10 }
  0x7f   :  { %v3215_v15 = vunpack.i.h.bf16 %v3213_v13  ;;  %v3214_v16 = vunpack.i.l.bf16 %v3213_v13 }
  0x81   :  { %v77_v20 = vpop.permute.xlu1 %76  ;;  %v197_v21 = vsel %vm196_vm5, %v188_v18, %v3214_v16  ;;  %v198_v0 = vsel %vm196_vm5, %v189_v29, %v3215_v15  ;;  %v732_v29 = vld [vmem:[%s4824_s3 + $0x40] sm:$0xff] }
  0x82   :  { %v114_v26 = vpop.permute.xlu0 %113  ;;  %v206_v27 = vsel %vm205_vm6, %v197_v21, %v3219_v17  ;;  %v207_v34 = vsel %vm205_vm6, %v198_v0, %v3220_v30  ;;  %v191_v41 = vsel %vm187_vm4, %v3395_v7, %v77_v20  ;;  %v733_v0 = vld [vmem:[%s4824_s3 + $0x48] sm:$0xff] }
  0x83   :  { %388 = vmatmul.mubr.f32.vlgmr.msra.gmra.mrb[0].mxu0 %v206_v27  ;;  %v199_v36 = vsel %vm196_vm5, %v190_v35, %v114_v26  ;;  %v731_v26 = vld [vmem:[%s4824_s3 + $0x38] sm:$0xff]  ;;  %v2949_v30 = vpack.c.bf16 %v733_v0, %v732_v29 }
  0x84   :  { %2747 = vmatprep.mubr.msk.f32.mxu0 %vm187_vm4, %v177_v22  ;;  %v729_v22 = vld [vmem:[%s4824_s3 + $0x28] sm:$0xff]  ;;  %v2946_v27 = vpack.c.bf16 %v731_v26, %v730_v24 }
  0x85   :  { %v153_v31 = vpop.permute.xlu1 %152 }
  0x86   :  { %v79_v33 = vpop.permute.xlu0 %78  ;;  %v208_v39 = vsel %vm205_vm6, %v199_v36, %v153_v31  ;;  %v734_v31 = vld [vmem:[%s4824_s3 + $0x50] sm:$0xff]  ;;  %v739_v36 = vld [vmem:[%s4824_s3 + $0x78] sm:$0xff] }
  0x87   :  { %394 = vmatmul.mubr.f32.gmra.mrb[2].mxu0 %v207_v34  ;;  %v192_v40 = vsel %vm187_vm4, %v3416_v25, %v79_v33  ;;  %v736_v33 = vld [vmem:[%s4824_s3 + $0x60] sm:$0xff]  ;;  %v737_v34 = vld [vmem:[%s4824_s3 + $0x68] sm:$0xff] }
  0x88   :  { %2748 = vmatprep.mubr.msk.f32.mxu0 %vm187_vm4, %v179_v32  ;;  %v735_v32 = vld [vmem:[%s4824_s3 + $0x58] sm:$0xff]  ;;  %v2955_v35 = vpack.c.bf16 %v737_v34, %v736_v33 }
  0x89   :  { %v118_v37 = vpop.permute.xlu1 %117 }
  0x8a   :  { %v116_v38 = vpop.permute.xlu0 %115  ;;  %v201_v2 = vsel %vm196_vm5, %v192_v40, %v118_v37 }
  0x8b   :  { %400 = vmatmul.mubr.f32.gmra.mrb[4].mxu0 %v208_v39  ;;  %v200_v43 = vsel %vm196_vm5, %v191_v41, %v116_v38  ;;  %v740_v38 = vld [vmem:[%s4824_s3 + $0x80] sm:$0xff]  ;;  %v741_v39 = vld [vmem:[%s4824_s3 + $0x88] sm:$0xff]  ;;  %v742_v41 = vld [vmem:[%s4824_s3 + $0x90] sm:$0xff] }
  0x8c   :  { %2749 = vmatprep.mubr.msk.f32.mxu0 %vm187_vm4, %v2739_v1  ;;  %v738_v1 = vld [vmem:[%s4824_s3 + $0x70] sm:$0xff]  ;;  %v2961_v40 = vpack.c.bf16 %v741_v39, %v740_v38 }
  0x8d   :  { %v157_v42 = vpop.permute.xlu1 %156  ;;  %v2958_v37 = vpack.c.bf16 %v739_v36, %v738_v1 }
  0x8e   :  { %v210_v44 = vsel %vm205_vm6, %v201_v2, %v157_v42  ;;  %v155_v45 = vpop.permute.xlu0 %154  ;;  %v743_v2 = vld [vmem:[%s4824_s3 + $0x98] sm:$0xff] }
  0x8f   :  { %v209_v46 = vsel %vm205_vm6, %v200_v43, %v155_v45  ;;  %v230_v60 = vcombine.high %v210_v44, %v182_v56  ;;  %v2964_v42 = vpack.c.bf16 %v743_v2, %v742_v41  ;;  %v3303_v43 = vmov 0.0  }
  0x90   :  { %v2738_v47 = vcombine.low %v209_v46, %v210_v44  ;;  %v744_v44 = vld [vmem:[%s4824_s3 + $0xa0] sm:$0xff]  ;;  %v278_v45 = vlaneseq }
  0x91   :  { %v120_v48 = vpop.permute.xlu1 %119 }
  0x92   :  { %v81_v25 = vpop.permute.xlu0 %80  ;;  %406 = vmatmul.mubr.f32.gmra.mrb[6].mxu0 %v2738_v47  ;;  %v3736_v46 = vshrl.u32 %v278_v45, 7 }
  0x93   :  { %v193_v50 = vsel %vm187_vm4, %v3427_v28, %v81_v25  ;;  %v186_v28 = vsel %vm172_vm3, %v183_v49, %v185_v54 }
  0x94   :  { %v202_v7 = vsel %vm196_vm5, %v193_v50, %v120_v48  ;;  %v3739_v47 = vsub.s32 0, %v3736_v46  ;;  %v276_v48 = vld [vmem:[%s4823_s2] sm:$0x3]  ;;  %v284_v49 = vsub.s32 1, %v3736_v46  ;;  %v3766_v29 = vsub.s32 2, %v3736_v46 }
  0x95   :  { %v83_v52 = vpop.permute.xlu1 %82 }
  0x96   :  { %v159_v53 = vpop.permute.xlu0 %158  ;;  %v194_v59 = vsel %vm187_vm4, %v3497_v63, %v83_v52  ;;  %v3746_v25 = vrot.slane %v276_v48, %v3739_v47  ;;  %v3750_v50 = vrot.slane %v276_v48, %v284_v49 }
  0x97   :  { %v211_v57 = vsel %vm205_vm6, %v202_v7, %v159_v53 }
  0x98   :  { %v231_v58 = vcombine.low %v211_v57, %v184_v51  ;;  %v2740_v5 = vcombine.low %v230_v60, %v211_v57  ;;  %v232_v6 = vcombine.high %v211_v57, %v184_v51  ;;  %v3304_v57 = vmov 1983009808  }
  0x99   :  { %v161_v61 = vpop.permute.xlu1 %160 }
  0x9a   :  { %v2741_v62 = vcombine.high %v182_v56, %v231_v58  ;;  %v122_v3 = vpop.permute.xlu0 %121  ;;  %v2952_v56 = vpack.c.bf16 %v735_v32, %v734_v31  ;;  %v461_v58 = vunpack.c.l.s4 %v3304_v57 }
  0x9b   :  { %v203_v4 = vsel %vm196_vm5, %v194_v59, %v122_v3 }
  0x9c   :  { %v212_v8 = vsel %vm205_vm6, %v203_v4, %v161_v61  ;;  %2750 = vmatprep.mubr.msk.f32.mxu0 %vm187_vm4, %v2741_v62  ;;  %v462_v3 = vunpack.c.0.s8 %v461_v58 }
  0x9d   :  { %v233_v9 = vcombine.low %v212_v8, %v186_v28  ;;  %412 = vmatmul.mubr.f32.gmra.mrb[8].mxu0 %v2740_v5  ;;  %v124_v10 = vpop.permute.xlu1 %123  ;;  %v2742_v15 = vcombine.low %v232_v6, %v212_v8  ;;  %v234_v17 = vcombine.high %v212_v8, %v186_v28 }
  0x9e   :  { %v85_v11 = vpop.permute.xlu0 %84  ;;  %v3759_v8 = vsub.s32 %v462_v3, %v3736_v46 }
  0x9f   :  { %v2743_v12 = vcombine.high %v184_v51, %v233_v9  ;;  %v195_v63 = vsel %vm187_vm4, %v3523_v14, %v85_v11  ;;  %v728_v14 = vld [vmem:[%s4824_s3 + $0x20] sm:$0xff] }
  0xa0   :  { %v204_v13 = vsel %vm196_vm5, %v195_v63, %v124_v10  ;;  %v2943_v23 = vpack.c.bf16 %v729_v22, %v728_v14 }
  0xa1   :  { %2751 = vmatprep.mubr.msk.f32.mxu0 %vm187_vm4, %v2743_v12 }
  0xa2   :  { %v163_v16 = vpop.permute.xlu0 %162  ;;  %418 = vmatmul.mubr.f32.gmra.mrb[10].mxu0 %v2742_v15  ;;  %2944 = vmatpush1.bf16.msra.mxu1 %v2943_v23 }
  0xa3   :  { %v213_v18 = vsel %vm205_vm6, %v204_v13, %v163_v16  ;;  %2945 = vmatprep.subr.bf16.mxu1 %v3302_v55  ;;  %vm2648_vm6 = vcmask 982016  }
  0xa4   :  { %v235_v19 = vcombine.low %v213_v18, %v185_v54  ;;  %v2744_v21 = vcombine.low %v234_v17, %v213_v18 }
  0xa6   :  { %v2745_v20 = vcombine.high %v186_v28, %v235_v19  ;;  %2947 = vmatpush1.bf16.msra.mxu1 %v2946_v27 }
  0xa7   :  { %2948 = vmatprep.subr.bf16.mxu1 %v3302_v55 }
  0xa8   :  { %2752 = vmatprep.mubr.msk.f32.mxu0 %vm187_vm4, %v2745_v20 }
  0xa9   :  { %424 = vmatmul.mubr.f32.gmra.mrb[12].mxu0 %v2744_v21 }
  0xaa   :  { %2950 = vmatpush1.bf16.msra.mxu1 %v2949_v30 }
  0xab   :  { %2951 = vmatprep.subr.bf16.mxu1 %v3302_v55 }
  0xae   :  { %2953 = vmatpush1.bf16.msra.mxu1 %v2952_v56 }
  0xaf   :  { %2954 = vmatprep.subr.bf16.mxu1 %v3302_v55 }
  0xb2   :  { %2956 = vmatpush1.bf16.msra.mxu1 %v2955_v35 }
  0xb3   :  { %2957 = vmatprep.subr.bf16.mxu1 %v3302_v55 }
  0xb6   :  { %2959 = vmatpush1.bf16.msra.mxu1 %v2958_v37 }
  0xb7   :  { %2960 = vmatprep.subr.bf16.mxu1 %v3302_v55 }
  0xba   :  { %2962 = vmatpush1.bf16.msra.mxu1 %v2961_v40 }
  0xbb   :  { %2963 = vmatprep.subr.bf16.mxu1 %v3302_v55 }
  0xbe   :  { %2965 = vmatpush1.bf16.msra.mxu1 %v2964_v42 }
  0xbf   :  { %1105 = vmatprep.subr.mxu1 %v3303_v43 }
  0xc2   :  { %1106 = vmatpush1.msra.mxu1 %v744_v44 }
  0xc3   :  { %3070 = vmatprep.subr.bf16.mxu1 %v3302_v55 }
 0x156   :  { %v389_v7 = vpop.f32.mrb[0].mxu0 }
 0x157   :  { %v390_v51 = vadd.f32 %v389_v7, %v3746_v25  ;;  %v391_v52 = vpop.f32.mrb[1].mxu0 }
 0x158   :  { %v392_v53 = vadd.f32 %v391_v52, %v3750_v50 }
 0x159   :  { %3231 = vtanh.f32 %v390_v51 }
 0x15a   :  { %3233 = vtanh.f32 %v392_v53  ;;  %v395_v54 = vpop.f32.mrb[2].mxu0 }
 0x15b   :  { %v396_v59 = vadd.f32 %v395_v54, %v3746_v25  ;;  %v397_v60 = vpop.f32.mrb[3].mxu0 }
 0x15c   :  { %v398_v61 = vadd.f32 %v397_v60, %v3750_v50 }
 0x15d   :  { %3235 = vtanh.f32 %v396_v59 }
 0x15e   :  { %3237 = vtanh.f32 %v398_v61  ;;  %v401_v62 = vpop.f32.mrb[4].mxu0 }
 0x15f   :  { %v402_v28 = vadd.f32 %v401_v62, %v3746_v25  ;;  %v403_v4 = vpop.f32.mrb[5].mxu0 }
 0x160   :  { %v404_v5 = vadd.f32 %v403_v4, %v3750_v50 }
 0x161   :  { %3239 = vtanh.f32 %v402_v28 }
 0x162   :  { %3241 = vtanh.f32 %v404_v5 }
 0x163   :  { %v3232_v6 = vpop.eup %3231 }
 0x164   :  { %v3234_v9 = vpop.eup %3233 }
 0x165   :  { %v458_v10 = vcombine.low %v3232_v6, %v3234_v9  ;;  %v459_v11 = vcombine.high %v3232_v6, %v3234_v9  ;;  %v407_v12 = vpop.f32.mrb[6].mxu0 }
 0x166   :  { %v408_v63 = vadd.f32 %v407_v12, %v3746_v25  ;;  %v409_v13 = vpop.f32.mrb[7].mxu0 }
 0x167   :  { %v3236_v15 = vpop.eup %3235  ;;  %v466_v16 = vrot.slane %v458_v10, %v3759_v8  ;;  %v473_v17 = vrot.slane %v459_v11, %v3759_v8  ;;  %v410_v18 = vadd.f32 %v409_v13, %v3750_v50 }
 0x168   :  { %v3238_v19 = vpop.eup %3237  ;;  %3243 = vtanh.f32 %v408_v63 }
 0x169   :  { %v474_v20 = vcombine.high %v466_v16, %v466_v16  ;;  %v2753_v21 = vrot.slane %v466_v16, 9  ;;  %v2755_v14 = vrot.slane %v473_v17, 9  ;;  %v476_v22 = vcombine.low %v3236_v15, %v3238_v19 }
 0x16a   :  { %v477_v23 = vcombine.high %v3236_v15, %v3238_v19  ;;  %3245 = vtanh.f32 %v410_v18  ;;  %v475_v24 = vcombine.high %v473_v17, %v473_v17 }
 0x16b   :  { %v3240_v26 = vpop.eup %3239  ;;  %v2754_v27 = vrot.slane %v474_v20, 9  ;;  %v484_v0 = vrot.slane %v476_v22, %v3759_v8  ;;  %v3769_v31 = vadd.f32 %v2753_v21, %v466_v16  ;;  %v3772_v33 = vadd.f32 %v2755_v14, %v473_v17 }
 0x16c   :  { %v3242_v30 = vpop.eup %3241  ;;  %v491_v32 = vrot.slane %v477_v23, %v3759_v8  ;;  %v2756_v56 = vrot.slane %v475_v24, 9 }
 0x16d   :  { %v494_v34 = vcombine.low %v3240_v26, %v3242_v30  ;;  %v495_v35 = vcombine.high %v3240_v26, %v3242_v30  ;;  %v492_v1 = vcombine.high %v484_v0, %v484_v0  ;;  %v2757_v36 = vrot.slane %v484_v0, 9 }
 0x16e   :  { %v493_v37 = vcombine.high %v491_v32, %v491_v32  ;;  %v2759_v38 = vrot.slane %v491_v32, 9  ;;  %v3774_v39 = vadd.f32 %v2754_v27, %v474_v20  ;;  %v3776_v40 = vadd.f32 %v2756_v56, %v475_v24 }
 0x16f   :  { %v502_v41 = vrot.slane %v494_v34, %v3759_v8  ;;  %v509_v2 = vrot.slane %v495_v35, %v3759_v8  ;;  %v2758_v42 = vrot.slane %v492_v1, 9  ;;  %v3780_v44 = vadd.f32 %v2757_v36, %v484_v0 }
 0x170   :  { %v413_v45 = vpop.f32.mrb[8].mxu0  ;;  %v2760_v48 = vrot.slane %v493_v37, 9  ;;  %v3782_v7 = vadd.f32 %v2759_v38, %v491_v32  ;;  %v780_v51 = vrot.slane %v3769_v31, %v3766_v29  ;;  %v788_v52 = vrot.slane %v3774_v39, %v3766_v29 }
 0x171   :  { %v510_v53 = vcombine.high %v502_v41, %v502_v41  ;;  %v3788_v54 = vcombine.high %v509_v2, %v509_v2  ;;  %v2761_v57 = vrot.slane %v502_v41, 9  ;;  %v2763_v58 = vrot.slane %v509_v2, 9  ;;  %v415_v59 = vpop.f32.mrb[9].mxu0 }
 0x172   :  { %v3244_v60 = vpop.eup %3243  ;;  %v414_v61 = vadd.f32 %v413_v45, %v3746_v25  ;;  %v416_v62 = vadd.f32 %v415_v59, %v3750_v50  ;;  %v701_v3 = vadd.f32 %v2758_v42, %v492_v1  ;;  %v3792_v28 = vadd.f32 %v2760_v48, %v493_v37 }
 0x173   :  { %v2762_v4 = vrot.slane %v510_v53, 9  ;;  %v2764_v5 = vrot.slane %v3788_v54, 9  ;;  %v3795_v6 = vadd.f32 %v2761_v57, %v502_v41  ;;  %v3797_v9 = vadd.f32 %v2763_v58, %v509_v2 }
 0x174   :  { %v3246_v10 = vpop.eup %3245  ;;  %3247 = vtanh.f32 %v414_v61  ;;  %v796_v11 = vrot.slane %v3772_v33, %v3766_v29  ;;  %v804_v12 = vrot.slane %v3776_v40, %v3766_v29  ;;  %v812_v63 = vrot.slane %v3780_v44, %v3766_v29 }
 0x175   :  { %v3805_v13 = vadd.f32 %v2762_v4, %v510_v53  ;;  %v844_v15 = vrot.slane %v3795_v6, %v3766_v29  ;;  %v512_v16 = vcombine.low %v3244_v60, %v3246_v10  ;;  %v513_v17 = vcombine.high %v3244_v60, %v3246_v10  ;;  %v419_v18 = vpop.f32.mrb[10].mxu0 }
 0x176   :  { %3249 = vtanh.f32 %v416_v62  ;;  %v420_v19 = vadd.f32 %v419_v18, %v3746_v25  ;;  %v421_v20 = vpop.f32.mrb[11].mxu0  ;;  %v820_v21 = vrot.slane %v701_v3, %v3766_v29  ;;  %v828_v14 = vrot.slane %v3782_v7, %v3766_v29 }
 0x177   :  { %v520_v22 = vrot.slane %v512_v16, %v3759_v8  ;;  %v527_v23 = vrot.slane %v513_v17, %v3759_v8  ;;  %v422_v24 = vadd.f32 %v421_v20, %v3750_v50  ;;  %v836_v26 = vrot.slane %v3792_v28, %v3766_v29 }
 0x178   :  { %3251 = vtanh.f32 %v420_v19  ;;  %v1011_v27 = vsel %vm997_vm7, %v788_v52, %v780_v51  ;;  %v776_v0 = vrot.slane %v3769_v31, %v3739_v47  ;;  %v784_v30 = vrot.slane %v3774_v39, %v3739_v47 }
 0x179   :  { %v2765_v32 = vrot.slane %v520_v22, 9  ;;  %3253 = vtanh.f32 %v422_v24  ;;  %v1012_v56 = vsel %vm999_vm8, %v796_v11, %v1011_v27  ;;  %v792_v34 = vrot.slane %v3772_v33, %v3739_v47 }
 0x17a   :  { %v1013_v35 = vsel %vm1001_vm9, %v804_v12, %v1012_v56  ;;  %v800_v1 = vrot.slane %v3776_v40, %v3739_v47  ;;  %v808_v36 = vrot.slane %v3780_v44, %v3739_v47  ;;  %v816_v31 = vrot.slane %v701_v3, %v3739_v47 }
 0x17b   :  { %v1014_v37 = vsel %vm1003_vm10, %v812_v63, %v1013_v35  ;;  %v824_v38 = vrot.slane %v3782_v7, %v3739_v47  ;;  %v832_v39 = vrot.slane %v3792_v28, %v3739_v47  ;;  %v998_v33 = vsel %vm997_vm7, %v784_v30, %v776_v0 }
 0x17c   :  { %v1015_v41 = vsel %vm1005_vm11, %v820_v21, %v1014_v37  ;;  %v1000_v2 = vsel %vm999_vm8, %v792_v34, %v998_v33  ;;  %v425_v40 = vpop.f32.mrb[12].mxu0  ;;  %v528_v42 = vcombine.high %v520_v22, %v520_v22  ;;  %v529_v45 = vcombine.high %v527_v23, %v527_v23 }
 0x17d   :  { %v1016_v44 = vsel %vm1007_vm12, %v828_v14, %v1015_v41  ;;  %v1002_v48 = vsel %vm1001_vm9, %v800_v1, %v1000_v2  ;;  %v426_v51 = vadd.f32 %v425_v40, %v3746_v25  ;;  %v427_v52 = vpop.f32.mrb[13].mxu0  ;;  %v2767_v7 = vrot.slane %v527_v23, 9 }
 0x17e   :  { %v3248_v53 = vpop.eup %3247  ;;  %v1017_v57 = vsel %vm1009_vm13, %v836_v26, %v1016_v44  ;;  %v1004_v58 = vsel %vm1003_vm10, %v808_v36, %v1002_v48  ;;  %v428_v59 = vadd.f32 %v427_v52, %v3750_v50  ;;  %v2766_v60 = vrot.slane %v528_v42, 9 }
 0x17f   :  { %2781 = vmatprep.mubr.msk.f32.mxu1 %vm1056_vm14, %v1017_v57  ;;  %v1006_v61 = vsel %vm1005_vm11, %v816_v31, %v1004_v58  ;;  %3255 = vtanh.f32 %v426_v51  ;;  %v2768_v62 = vrot.slane %v529_v45, 9  ;;  %v3849_v3 = vadd.f32 %v2764_v5, %v3788_v54 }
 0x180   :  { %v3250_v25 = vpop.eup %3249  ;;  %v1008_v28 = vsel %vm1007_vm12, %v824_v38, %v1006_v61  ;;  %3257 = vtanh.f32 %v428_v59  ;;  %v3852_v4 = vadd.f32 %v2765_v32, %v520_v22  ;;  %v3854_v10 = vadd.f32 %v2766_v60, %v528_v42 }
 0x181   :  { %v530_v11 = vcombine.low %v3248_v53, %v3250_v25  ;;  %v531_v50 = vcombine.high %v3248_v53, %v3250_v25  ;;  %v1010_v12 = vsel %vm1009_vm13, %v832_v39, %v1008_v28  ;;  %v3857_v63 = vadd.f32 %v2767_v7, %v527_v23 }
 0x182   :  { %v3252_v16 = vpop.eup %3251  ;;  %1130 = vmatmul.mubr.f32.vlgmr.msra.gmra.mrb[0].mxu1 %v1010_v12  ;;  %v3859_v17 = vadd.f32 %v2768_v62, %v529_v45  ;;  %v852_v54 = vrot.slane %v3805_v13, %v3766_v29  ;;  %v860_v5 = vrot.slane %v3797_v9, %v3766_v29  ;;  %v868_v18 = vrot.slane %v3849_v3, %v3766_v29 }
 0x183   :  { %v3254_v19 = vpop.eup %3253  ;;  %v538_v20 = vrot.slane %v530_v11, %v3759_v8  ;;  %v545_v21 = vrot.slane %v531_v50, %v3759_v8  ;;  %v876_v14 = vrot.slane %v3852_v4, %v3766_v29  ;;  %v884_v22 = vrot.slane %v3854_v10, %v3766_v29 }
 0x184   :  { %v548_v23 = vcombine.low %v3252_v16, %v3254_v19  ;;  %v549_v24 = vcombine.high %v3252_v16, %v3254_v19  ;;  %v892_v26 = vrot.slane %v3857_v63, %v3766_v29  ;;  %v900_v27 = vrot.slane %v3859_v17, %v3766_v29 }
 0x185   :  { %v546_v0 = vcombine.high %v538_v20, %v538_v20  ;;  %v547_v30 = vcombine.high %v545_v21, %v545_v21  ;;  %v2769_v32 = vrot.slane %v538_v20, 9  ;;  %v2771_v56 = vrot.slane %v545_v21, 9 }
 0x186   :  { %v556_v34 = vrot.slane %v548_v23, %v3759_v8  ;;  %v563_v35 = vrot.slane %v549_v24, %v3759_v8  ;;  %v1025_v1 = vsel %vm997_vm7, %v852_v54, %v844_v15  ;;  %v840_v36 = vrot.slane %v3795_v6, %v3739_v47 }
 0x187   :  { %v2770_v31 = vrot.slane %v546_v0, 9  ;;  %v2772_v37 = vrot.slane %v547_v30, 9  ;;  %v3885_v38 = vadd.f32 %v2769_v32, %v538_v20  ;;  %v3887_v39 = vadd.f32 %v2771_v56, %v545_v21 }
 0x188   :  { %v2773_v33 = vrot.slane %v556_v34, 9  ;;  %v1026_v41 = vsel %vm999_vm8, %v860_v5, %v1025_v1  ;;  %v848_v2 = vrot.slane %v3805_v13, %v3739_v47  ;;  %v856_v40 = vrot.slane %v3797_v9, %v3739_v47 }
 0x189   :  { %v3256_v42 = vpop.eup %3255  ;;  %v713_v15 = vadd.f32 %v2770_v31, %v546_v0  ;;  %v908_v6 = vrot.slane %v3885_v38, %v3766_v29  ;;  %v1027_v45 = vsel %vm1001_vm9, %v868_v18, %v1026_v41  ;;  %v864_v44 = vrot.slane %v3849_v3, %v3739_v47 }
 0x18a   :  { %v3258_v48 = vpop.eup %3257  ;;  %v1028_v51 = vsel %vm1003_vm10, %v876_v14, %v1027_v45  ;;  %v872_v52 = vrot.slane %v3852_v4, %v3739_v47  ;;  %v880_v13 = vrot.slane %v3854_v10, %v3739_v47  ;;  %v888_v9 = vrot.slane %v3857_v63, %v3739_v47 }
 0x18b   :  { %v566_v7 = vcombine.low %v3256_v42, %v3258_v48  ;;  %v567_v53 = vcombine.high %v3256_v42, %v3258_v48  ;;  %v1029_v57 = vsel %vm1005_vm11, %v884_v22, %v1028_v51  ;;  %v896_v58 = vrot.slane %v3859_v17, %v3739_v47 }
 0x18c   :  { %v1030_v59 = vsel %vm1007_vm12, %v892_v26, %v1029_v57  ;;  %v1018_v60 = vsel %vm997_vm7, %v848_v2, %v840_v36  ;;  %v564_v61 = vcombine.high %v556_v34, %v556_v34  ;;  %v565_v62 = vcombine.high %v563_v35, %v563_v35 }
 0x18d   :  { %v574_v3 = vrot.slane %v566_v7, %v3759_v8  ;;  %v581_v25 = vrot.slane %v567_v53, %v3759_v8  ;;  %v1031_v28 = vsel %vm1009_vm13, %v900_v27, %v1030_v59  ;;  %v1019_v4 = vsel %vm999_vm8, %v856_v40, %v1018_v60 }
 0x18e   :  { %2782 = vmatprep.mubr.msk.f32.mxu1 %vm1056_vm14, %v1031_v28  ;;  %v1020_v10 = vsel %vm1001_vm9, %v864_v44, %v1019_v4  ;;  %v2774_v11 = vrot.slane %v564_v61, 9  ;;  %v2775_v50 = vrot.slane %v563_v35, 9  ;;  %v2776_v12 = vrot.slane %v565_v62, 9 }
 0x18f   :  { %v1021_v63 = vsel %vm1003_vm10, %v872_v52, %v1020_v10  ;;  %v715_v16 = vadd.f32 %v2772_v37, %v547_v30  ;;  %v716_v17 = vadd.f32 %v2773_v33, %v556_v34  ;;  %v916_v54 = vrot.slane %v713_v15, %v3766_v29 }
 0x190   :  { %v1022_v5 = vsel %vm1005_vm11, %v880_v13, %v1021_v63  ;;  %v717_v18 = vadd.f32 %v2774_v11, %v564_v61  ;;  %v718_v19 = vadd.f32 %v2775_v50, %v563_v35  ;;  %v719_v20 = vadd.f32 %v2776_v12, %v565_v62 }
 0x191   :  { %v1023_v21 = vsel %vm1007_vm12, %v888_v9, %v1022_v5  ;;  %v924_v14 = vrot.slane %v3887_v39, %v3766_v29  ;;  %v932_v22 = vrot.slane %v715_v16, %v3766_v29  ;;  %v940_v23 = vrot.slane %v716_v17, %v3766_v29 }
 0x192   :  { %v1024_v24 = vsel %vm1009_vm13, %v896_v58, %v1023_v21  ;;  %v948_v26 = vrot.slane %v717_v18, %v3766_v29  ;;  %v956_v27 = vrot.slane %v718_v19, %v3766_v29  ;;  %v964_v0 = vrot.slane %v719_v20, %v3766_v29 }
 0x193   :  { %1135 = vmatmul.mubr.f32.gmra.mrb[2].mxu1 %v1024_v24  ;;  %v1039_v30 = vsel %vm997_vm7, %v916_v54, %v908_v6  ;;  %v904_v32 = vrot.slane %v3885_v38, %v3739_v47  ;;  %v912_v56 = vrot.slane %v713_v15, %v3739_v47  ;;  %v920_v34 = vrot.slane %v3887_v39, %v3739_v47 }
 0x194   :  { %v1040_v35 = vsel %vm999_vm8, %v924_v14, %v1039_v30  ;;  %v928_v1 = vrot.slane %v715_v16, %v3739_v47  ;;  %v936_v36 = vrot.slane %v716_v17, %v3739_v47  ;;  %v944_v31 = vrot.slane %v717_v18, %v3739_v47  ;;  %v1559_v18 = vld [vmem:[%s4825_s4 + $0x8] sm:$0xff]  ;;  %v1560_v14 = vld [vmem:[%s4825_s4 + $0x10] sm:$0xff] }
 0x195   :  { %v1041_v37 = vsel %vm1001_vm9, %v932_v22, %v1040_v35  ;;  %v952_v33 = vrot.slane %v718_v19, %v3739_v47  ;;  %v960_v41 = vrot.slane %v719_v20, %v3739_v47  ;;  %v1032_v38 = vsel %vm997_vm7, %v912_v56, %v904_v32  ;;  %v1561_v19 = vld [vmem:[%s4825_s4 + $0x18] sm:$0xff]  ;;  %v1558_v20 = vld [vmem:[%s4825_s4] sm:$0xff]  ;;  %v1563_v22 = vld [vmem:[%s4825_s4 + $0x28] sm:$0xff] }
 0x196   :  { %v1042_v2 = vsel %vm1003_vm10, %v940_v23, %v1041_v37  ;;  %v1033_v39 = vsel %vm999_vm8, %v920_v34, %v1032_v38  ;;  %v582_v40 = vcombine.high %v574_v3, %v574_v3  ;;  %v583_v42 = vcombine.high %v581_v25, %v581_v25  ;;  %v1565_v23 = vld [vmem:[%s4825_s4 + $0x38] sm:$0xff]  ;;  %v1567_v30 = vld [vmem:[%s4825_s4 + $0x48] sm:$0xff]  ;;  %v1566_v35 = vld [vmem:[%s4825_s4 + $0x40] sm:$0xff] }
 0x197   :  { %v1043_v15 = vsel %vm1005_vm11, %v948_v26, %v1042_v2  ;;  %v1034_v6 = vsel %vm1001_vm9, %v928_v1, %v1033_v39  ;;  %v2777_v45 = vrot.slane %v574_v3, 9  ;;  %v2779_v44 = vrot.slane %v581_v25, 9  ;;  %v1569_v32 = vld [vmem:[%s4825_s4 + $0x58] sm:$0xff]  ;;  %v1568_v1 = vld [vmem:[%s4825_s4 + $0x50] sm:$0xff]  ;;  %v1575_v2 = vld [vmem:[%s4825_s4 + $0x88] sm:$0xff] }
 0x198   :  { %v1044_v48 = vsel %vm1007_vm12, %v956_v27, %v1043_v15  ;;  %v1035_v51 = vsel %vm1003_vm10, %v936_v36, %v1034_v6  ;;  %v2778_v52 = vrot.slane %v582_v40, 9  ;;  %v2780_v13 = vrot.slane %v583_v42, 9  ;;  %v1562_v27 = vld [vmem:[%s4825_s4 + $0x20] sm:$0xff]  ;;  %v1571_v36 = vld [vmem:[%s4825_s4 + $0x68] sm:$0xff]  ;;  %v1572_v38 = vld [vmem:[%s4825_s4 + $0x70] sm:$0xff] }
 0x199   :  { %v1045_v9 = vsel %vm1009_vm13, %v964_v0, %v1044_v48  ;;  %v1036_v7 = vsel %vm1005_vm11, %v944_v31, %v1035_v51  ;;  %v720_v53 = vadd.f32 %v2777_v45, %v574_v3  ;;  %v722_v57 = vadd.f32 %v2779_v44, %v581_v25  ;;  %v1564_v0 = vld [vmem:[%s4825_s4 + $0x30] sm:$0xff]  ;;  %v1573_v31 = vld [vmem:[%s4825_s4 + $0x78] sm:$0xff]  ;;  %v1574_v15 = vld [vmem:[%s4825_s4 + $0x80] sm:$0xff] }
 0x19a   :  { %2783 = vmatprep.mubr.msk.f32.mxu1 %vm1056_vm14, %v1045_v9  ;;  %v1037_v58 = vsel %vm1007_vm12, %v952_v33, %v1036_v7  ;;  %v721_v59 = vadd.f32 %v2778_v52, %v582_v40  ;;  %v723_v60 = vadd.f32 %v2780_v13, %v583_v42  ;;  %v2966_v21 = vpack.c.bf16 %v1561_v19, %v1559_v18  ;;  %v1577_v39 = vld [vmem:[%s4825_s4 + $0x98] sm:$0xff]  ;;  %v1576_v6 = vld [vmem:[%s4825_s4 + $0x90] sm:$0xff]  ;;  %v1579_v45 = vld [vmem:[%s4825_s4 + $0xa8] sm:$0xff] }
 0x19b   :  { %v1038_v61 = vsel %vm1009_vm13, %v960_v41, %v1037_v58  ;;  %v972_v62 = vrot.slane %v720_v53, %v3766_v29  ;;  %v968_v4 = vrot.slane %v720_v53, %v3739_v47  ;;  %v988_v3 = vrot.slane %v722_v57, %v3766_v29  ;;  %v1570_v41 = vld [vmem:[%s4825_s4 + $0x60] sm:$0xff]  ;;  %v1581_v44 = vld [vmem:[%s4825_s4 + $0xb8] sm:$0xff]  ;;  %v1580_v13 = vld [vmem:[%s4825_s4 + $0xb0] sm:$0xff] }
 0x19c   :  { %1140 = vmatmul.mubr.f32.gmra.mrb[4].mxu1 %v1038_v61  ;;  %v980_v28 = vrot.slane %v721_v59, %v3766_v29  ;;  %v976_v10 = vrot.slane %v721_v59, %v3739_v47  ;;  %v984_v25 = vrot.slane %v722_v57, %v3739_v47  ;;  %v996_v11 = vrot.slane %v723_v60, %v3766_v29  ;;  %v1578_v52 = vld [vmem:[%s4825_s4 + $0xa0] sm:$0xff]  ;;  %v1583_v9 = vld [vmem:[%s4825_s4 + $0xc8] sm:$0xff]  ;;  %v1585_v7 = vld [vmem:[%s4825_s4 + $0xd8] sm:$0xff] }
 0x19d   :  { %v992_v12 = vrot.slane %v723_v60, %v3739_v47  ;;  %v2968_v24 = vpack.c.bf16 %v1560_v14, %v1558_v20  ;;  %v2970_v26 = vpack.c.bf16 %v1565_v23, %v1563_v22  ;;  %2967 = vmatprep.subr.bf16.mxu0 %v2966_v21  ;;  %v2972_v56 = vpack.c.bf16 %v1564_v0, %v1562_v27  ;;  %v1582_v58 = vld [vmem:[%s4825_s4 + $0xc0] sm:$0xff]  ;;  %v1584_v59 = vld [vmem:[%s4825_s4 + $0xd0] sm:$0xff]  ;;  %v1587_v60 = vld [vmem:[%s4825_s4 + $0xe8] sm:$0xff] }
 0x19e   :  { %v1049_v50 = vsel %vm997_vm7, %v980_v28, %v972_v62  ;;  %v1046_v63 = vsel %vm997_vm7, %v976_v10, %v968_v4  ;;  %v2974_v34 = vpack.c.bf16 %v1569_v32, %v1567_v30  ;;  %v2976_v37 = vpack.c.bf16 %v1568_v1, %v1566_v35  ;;  %v1589_v61 = vld [vmem:[%s4825_s4 + $0xf8] sm:$0xff]  ;;  %v1586_v4 = vld [vmem:[%s4825_s4 + $0xe0] sm:$0xff]  ;;  %v1588_v10 = vld [vmem:[%s4825_s4 + $0xf0] sm:$0xff] }
 0x19f   :  { %v1050_v16 = vsel %vm999_vm8, %v988_v3, %v1049_v50  ;;  %v1047_v17 = vsel %vm999_vm8, %v984_v25, %v1046_v63  ;;  %2969 = vmatpush1.bf16.msra.mxu0 %v2968_v24  ;;  %v2978_v33 = vpack.c.bf16 %v1573_v31, %v1571_v36  ;;  %v2980_v40 = vpack.c.bf16 %v1572_v38, %v1570_v41  ;;  %v1591_v3 = vld [vmem:[%s4825_s4 + $0x108] sm:$0xff]  ;;  %v1593_v25 = vld [vmem:[%s4825_s4 + $0x118] sm:$0xff]  ;;  %v1592_v63 = vld [vmem:[%s4825_s4 + $0x110] sm:$0xff] }
 0x1a0   :  { %v1051_v54 = vsel %vm1001_vm9, %v996_v11, %v1050_v16  ;;  %v1048_v5 = vsel %vm1001_vm9, %v992_v12, %v1047_v17  ;;  %2971 = vmatprep.subr.bf16.mxu0 %v2970_v26  ;;  %v2982_v42 = vpack.c.bf16 %v1577_v39, %v1575_v2  ;;  %v2984_v48 = vpack.c.bf16 %v1576_v6, %v1574_v15  ;;  %v1590_v12 = vld [vmem:[%s4825_s4 + $0x100] sm:$0xff]  ;;  %v1595_v16 = vld [vmem:[%s4825_s4 + $0x128] sm:$0xff]  ;;  %v1597_v17 = vld [vmem:[%s4825_s4 + $0x138] sm:$0xff] }
 0x1a1   :  { %2784 = vmatprep.mubr.msk.f32.mxu1 %vm1056_vm14, %v1051_v54  ;;  %v2986_v51 = vpack.c.bf16 %v1581_v44, %v1579_v45  ;;  %v2988_v53 = vpack.c.bf16 %v1580_v13, %v1578_v52  ;;  %v2990_v57 = vpack.c.bf16 %v1585_v7, %v1583_v9  ;;  %v2992_v62 = vpack.c.bf16 %v1584_v59, %v1582_v58  ;;  %v1594_v18 = vld [vmem:[%s4825_s4 + $0x120] sm:$0xff]  ;;  %v1596_v19 = vld [vmem:[%s4825_s4 + $0x130] sm:$0xff]  ;;  %v1599_v20 = vld [vmem:[%s4825_s4 + $0x148] sm:$0xff] }
 0x1a2   :  { %1145 = vmatmul.mubr.f32.gmra.mrb[6].mxu1 %v1048_v5  ;;  %v2994_v28 = vpack.c.bf16 %v1589_v61, %v1587_v60  ;;  %v2996_v11 = vpack.c.bf16 %v1588_v10, %v1586_v4  ;;  %v2998_v50 = vpack.c.bf16 %v1593_v25, %v1591_v3  ;;  %v3000_v54 = vpack.c.bf16 %v1592_v63, %v1590_v12  ;;  %v1601_v21 = vld [vmem:[%s4825_s4 + $0x158] sm:$0xff]  ;;  %v1598_v23 = vld [vmem:[%s4825_s4 + $0x140] sm:$0xff]  ;;  %v1600_v24 = vld [vmem:[%s4825_s4 + $0x150] sm:$0xff] }
 0x1a3   :  { %2973 = vmatpush1.bf16.msra.mxu0 %v2972_v56  ;;  %v3002_v5 = vpack.c.bf16 %v1597_v17, %v1595_v16  ;;  %v3004_v14 = vpack.c.bf16 %v1596_v19, %v1594_v18  ;;  %v3006_v22 = vpack.c.bf16 %v1601_v21, %v1599_v20  ;;  %v1603_v26 = vld [vmem:[%s4825_s4 + $0x168] sm:$0xff]  ;;  %v1605_v27 = vld [vmem:[%s4825_s4 + $0x178] sm:$0xff]  ;;  %v3008_v0 = vpack.c.bf16 %v1600_v24, %v1598_v23  ;;  %v1602_v32 = vld [vmem:[%s4825_s4 + $0x160] sm:$0xff] }
 0x1a4   :  { %2975 = vmatprep.subr.bf16.mxu0 %v2974_v34  ;;  %v3010_v30 = vpack.c.bf16 %v1605_v27, %v1603_v26  ;;  %v1604_v56 = vld [vmem:[%s4825_s4 + $0x170] sm:$0xff]  ;;  %v1607_v38 = vld [vmem:[%s4825_s4 + $0x188] sm:$0xff]  ;;  %v1609_v2 = vld [vmem:[%s4825_s4 + $0x198] sm:$0xff] }
 0x1a5   :  { %v3012_v34 = vpack.c.bf16 %v1604_v56, %v1602_v32  ;;  %v1606_v39 = vld [vmem:[%s4825_s4 + $0x180] sm:$0xff]  ;;  %v1608_v15 = vld [vmem:[%s4825_s4 + $0x190] sm:$0xff]  ;;  %v1613_v52 = vld [vmem:[%s4825_s4 + $0x1b8] sm:$0xff] }
 0x1a6   :  { %v3016_v6 = vpack.c.bf16 %v1608_v15, %v1606_v39  ;;  %v1610_v13 = vld [vmem:[%s4825_s4 + $0x1a0] sm:$0xff]  ;;  %v1612_v59 = vld [vmem:[%s4825_s4 + $0x1b0] sm:$0xff]  ;;  %v1615_v12 = vld [vmem:[%s4825_s4 + $0x1c8] sm:$0xff] }
 0x1a7   :  { %2977 = vmatpush1.bf16.msra.mxu0 %v2976_v37  ;;  %v3020_v61 = vpack.c.bf16 %v1612_v59, %v1610_v13  ;;  %v1617_v63 = vld [vmem:[%s4825_s4 + $0x1d8] sm:$0xff]  ;;  %v1614_v17 = vld [vmem:[%s4825_s4 + $0x1c0] sm:$0xff]  ;;  %v1619_v21 = vld [vmem:[%s4825_s4 + $0x1e8] sm:$0xff] }
 0x1a8   :  { %2979 = vmatprep.subr.bf16.mxu0 %v2978_v33  ;;  %v3022_v16 = vpack.c.bf16 %v1617_v63, %v1615_v12  ;;  %v1620_v26 = vld [vmem:[%s4825_s4 + $0x1f0] sm:$0xff]  ;;  %v1623_v39 = vld [vmem:[%s4825_s4 + $0x208] sm:$0xff] }
 0x1ab   :  { %2981 = vmatpush1.bf16.msra.mxu0 %v2980_v40 }
 0x1ac   :  { %2983 = vmatprep.subr.bf16.mxu0 %v2982_v42  ;;  %v3014_v42 = vpack.c.bf16 %v1609_v2, %v1607_v38 }
 0x1af   :  { %2985 = vmatpush1.bf16.msra.mxu0 %v2984_v48 }
 0x1b0   :  { %2987 = vmatprep.subr.bf16.mxu0 %v2986_v51  ;;  %v1611_v51 = vld [vmem:[%s4825_s4 + $0x1a8] sm:$0xff] }
 0x1b1   :  { %v3018_v58 = vpack.c.bf16 %v1613_v52, %v1611_v51 }
 0x1b3   :  { %2989 = vmatpush1.bf16.msra.mxu0 %v2988_v53 }
 0x1b4   :  { %2991 = vmatprep.subr.bf16.mxu0 %v2990_v57 }
 0x1b7   :  { %2993 = vmatpush1.bf16.msra.mxu0 %v2992_v62 }
 0x1b8   :  { %2995 = vmatprep.subr.bf16.mxu0 %v2994_v28 }
 0x1bb   :  { %2997 = vmatpush1.bf16.msra.mxu0 %v2996_v11 }
 0x1bc   :  { %2999 = vmatprep.subr.bf16.mxu0 %v2998_v50 }
 0x1bf   :  { %3001 = vmatpush1.bf16.msra.mxu0 %v3000_v54  ;;  %v1616_v54 = vld [vmem:[%s4825_s4 + $0x1d0] sm:$0xff] }
 0x1c0   :  { %3003 = vmatprep.subr.bf16.mxu0 %v3002_v5  ;;  %v3024_v20 = vpack.c.bf16 %v1616_v54, %v1614_v17 }
 0x1c3   :  { %3005 = vmatpush1.bf16.msra.mxu0 %v3004_v14  ;;  %v1621_v14 = vld [vmem:[%s4825_s4 + $0x1f8] sm:$0xff] }
 0x1c4   :  { %3007 = vmatprep.subr.bf16.mxu0 %v3006_v22  ;;  %v1618_v22 = vld [vmem:[%s4825_s4 + $0x1e0] sm:$0xff]  ;;  %v3026_v24 = vpack.c.bf16 %v1621_v14, %v1619_v21  ;;  %v2062_v21 = vld [vmem:[%s4827_s6 + $0x8] sm:$0xff] }
 0x1c7   :  { %3009 = vmatpush1.bf16.msra.mxu0 %v3008_v0 }
 0x1c8   :  { %3011 = vmatprep.subr.bf16.mxu0 %v3010_v30 }
 0x1cb   :  { %3013 = vmatpush1.bf16.msra.mxu0 %v3012_v34 }
 0x1cc   :  { %3015 = vmatprep.subr.bf16.mxu0 %v3014_v42 }
 0x1cf   :  { %3017 = vmatpush1.bf16.msra.mxu0 %v3016_v6 }
 0x1d0   :  { %3019 = vmatprep.subr.bf16.mxu0 %v3018_v58 }
 0x1d3   :  { %3021 = vmatpush1.bf16.msra.mxu0 %v3020_v61 }
 0x1d4   :  { %3023 = vmatprep.subr.bf16.mxu0 %v3022_v16 }
 0x1d7   :  { %3025 = vmatpush1.bf16.msra.mxu0 %v3024_v20  ;;  %v2061_v20 = vld [vmem:[%s4827_s6] sm:$0xff] }
 0x1d8   :  { %3027 = vmatprep.subr.bf16.mxu0 %v3026_v24  ;;  %v3071_v14 = vpack.c.bf16 %v2062_v21, %v2061_v20 }
 0x1da   :  { %3072 = vmatpush1.bf16.msra.mxu1 %v3071_v14 }
 0x1db   :  { %3073 = vmatprep.subr.bf16.mxu1 %v3302_v55 }
 0x255   :  { %v1131_v35 = vpop.f32.mrb[0].mxu1 }
 0x256   :  { %v1154_v1 = vcombine.high %v1131_v35, %v1131_v35  ;;  %v1133_v36 = vpop.f32.mrb[1].mxu1  ;;  %v1161_v37 = vrot.slane %v1131_v35, %v3759_v8 }
 0x258   :  { %v1168_v31 = vrot.slane %v1154_v1, %v3759_v8  ;;  %v1169_v41 = vcombine.high %v1161_v37, %v1161_v37 }
 0x25a   :  { %v1170_v33 = vcombine.high %v1168_v31, %v1168_v31  ;;  %v1213_v45 = vcombine.low %v1161_v37, %v1169_v41  ;;  %v1299_v9 = vcombine.low %v1169_v41, %v1168_v31 }
 0x25c   :  { %v1214_v40 = vcombine.low %v1168_v31, %v1170_v33  ;;  %v1221_v60 = vrot.slane %v1213_v45, %v3759_v8  ;;  %v1307_v11 = vrot.slane %v1299_v9, %v3759_v8  ;;  %v3028_v31 = vpack.c.bf16 %v1620_v26, %v1618_v22 }
 0x25e   :  { %v4128_v44 = vrot.slane %v1214_v40, %v3759_v8  ;;  %v1625_v40 = vld [vmem:[%s4825_s4 + $0x218] sm:$0xff]  ;;  %3029 = vmatpush1.bf16.msra.mxu0 %v3028_v31 }
 0x25f   :  { %v3030_v42 = vpack.c.bf16 %v1625_v40, %v1623_v39 }
 0x260   :  { %v4155_v10 = vcombine.low %v1221_v60, %v4128_v44 }
 0x261   :  { %3031 = vmatprep.subr.bf16.mxu0 %v3030_v42  ;;  %v1626_v42 = vld [vmem:[%s4825_s4 + $0x220] sm:$0xff] }
 0x262   :  { %v1281_v23 = vrot.slane %v4155_v10, 1 }
 0x266   :  { %v1136_v48 = vpop.f32.mrb[2].mxu1 }
 0x267   :  { %v1171_v7 = vcombine.high %v1136_v48, %v1136_v48  ;;  %v4140_v53 = vrot.slane %v1136_v48, %v3759_v8  ;;  %v1138_v57 = vpop.f32.mrb[3].mxu1 }
 0x269   :  { %v4147_v62 = vrot.slane %v1171_v7, %v3759_v8  ;;  %v4151_v28 = vcombine.high %v4140_v53, %v4140_v53  ;;  %v1300_v4 = vcombine.low %v1170_v33, %v4140_v53 }
 0x26b   :  { %v1265_v3 = vcombine.low %v4140_v53, %v4151_v28  ;;  %v1359_v25 = vcombine.low %v4151_v28, %v4147_v62  ;;  %v1314_v50 = vrot.slane %v1300_v4, %v3759_v8  ;;  %v1187_v34 = vcombine.high %v4147_v62, %v4147_v62 }
 0x26c   :  { %v1322_v7 = vrot.slane %v4151_v28, %v3759_v8 }
 0x26d   :  { %v1315_v5 = vcombine.low %v1307_v11, %v1314_v50  ;;  %v4176_v18 = vrot.slane %v1265_v3, %v3759_v8  ;;  %v4179_v19 = vrot.slane %v1359_v25, %v3759_v8 }
 0x26f   :  { %1347 = vrot.lane.b32.xlu0 %v1315_v5, %s3305_s19  ;;  %v1375_v27 = vrot.slane %v1315_v5, 1  ;;  %v1282_v0 = vrot.slane %v4176_v18, 1  ;;  %v1376_v30 = vrot.slane %v4179_v19, 1  ;;  %v1141_v32 = vpop.f32.mrb[4].mxu1  ;;  %v1393_v56 = vcombine.low %v4128_v44, %v4176_v18 }
 0x270   :  { %v1188_v35 = vcombine.high %v1141_v32, %v1141_v32  ;;  %v1195_v1 = vrot.slane %v1141_v32, %v3759_v8  ;;  %v1143_v36 = vpop.f32.mrb[5].mxu1  ;;  %v1400_v18 = vrot.slane %v4147_v62, %v3759_v8 }
 0x271   :  { %v1283_v37 = vsel %vm55_vm1, %v1281_v23, %v1282_v0  ;;  %v1377_v33 = vsel %vm55_vm1, %v1375_v27, %v1376_v30  ;;  %v1624_v36 = vld [vmem:[%s4825_s4 + $0x210] sm:$0xff] }
 0x272   :  { %1287 = vrot.lane.b32.xlu1 %v1283_v37, %s3306_s20  ;;  %v1202_v41 = vrot.slane %v1188_v35, %v3759_v8  ;;  %v1203_v38 = vcombine.high %v1195_v1, %v1195_v1  ;;  %v1237_v2 = vcombine.low %v1187_v34, %v1195_v1  ;;  %v1627_v37 = vld [vmem:[%s4825_s4 + $0x228] sm:$0xff] }
 0x273   :  { %1289 = vrot.lane.b32.xlu0 %v1282_v0, %s3306_s20 }
 0x274   :  { %v4213_v15 = vcombine.high %v1202_v41, %v1202_v41  ;;  %v1323_v6 = vcombine.low %v1195_v1, %v1203_v38  ;;  %v1238_v45 = vcombine.low %v1203_v38, %v1202_v41  ;;  %v1245_v48 = vrot.slane %v1237_v2, %v3759_v8  ;;  %v1622_v1 = vld [vmem:[%s4825_s4 + $0x200] sm:$0xff] }
 0x275   :  { %v1146_v44 = vpop.f32.mrb[6].mxu1  ;;  %v3032_v2 = vpack.c.bf16 %v1624_v36, %v1622_v1 }
 0x276   :  { %1381 = vrot.lane.b32.xlu1 %v1377_v33, %s3307_s23  ;;  %v1211_v51 = vrot.slane %v1146_v44, %v3759_v8  ;;  %v1148_v52 = vpop.f32.mrb[7].mxu1  ;;  %v1324_v13 = vcombine.low %v1202_v41, %v4213_v15  ;;  %v1252_v9 = vrot.slane %v1238_v45, %v3759_v8  ;;  %v1331_v57 = vrot.slane %v1323_v6, %v3759_v8  ;;  %v1629_v33 = vld [vmem:[%s4825_s4 + $0x238] sm:$0xff]  ;;  %v1628_v6 = vld [vmem:[%s4825_s4 + $0x230] sm:$0xff]  ;;  %v1631_v44 = vld [vmem:[%s4825_s4 + $0x248] sm:$0xff] }
 0x277   :  { %v3034_v40 = vpack.c.bf16 %v1629_v33, %v1627_v37  ;;  %v1643_v37 = vld [vmem:[%s4825_s4 + $0x2a8] sm:$0xff]  ;;  %v1645_v33 = vld [vmem:[%s4825_s4 + $0x2b8] sm:$0xff] }
 0x278   :  { %v1212_v58 = vcombine.high %v1211_v51, %v1211_v51  ;;  %v1338_v59 = vrot.slane %v1324_v13, %v3759_v8  ;;  %v4224_v60 = vcombine.low %v1245_v48, %v1252_v9  ;;  %v1273_v61 = vcombine.low %v4213_v15, %v1211_v51  ;;  %v1633_v48 = vld [vmem:[%s4825_s4 + $0x258] sm:$0xff] }
 0x279   :  { %v1346_v5 = vrot.slane %v1211_v51, %v3759_v8 }
 0x27a   :  { %1349 = vrot.lane.b32.xlu1 %v1322_v7, %s3305_s19  ;;  %v1367_v4 = vcombine.low %v1211_v51, %v1212_v58  ;;  %v1339_v3 = vcombine.low %v1331_v57, %v1338_v59  ;;  %v1280_v25 = vrot.slane %v1273_v61, %v3759_v8  ;;  %v1284_v50 = vrot.slane %v4224_v60, 1  ;;  %v1630_v7 = vld [vmem:[%s4825_s4 + $0x240] sm:$0xff]  ;;  %v1632_v57 = vld [vmem:[%s4825_s4 + $0x250] sm:$0xff] }
 0x27b   :  { %v1408_v19 = vrot.slane %v1212_v58, %v3759_v8  ;;  %v3036_v51 = vpack.c.bf16 %v1628_v6, %v1626_v42  ;;  %v3050_v42 = vpack.c.bf16 %v1645_v33, %v1643_v37  ;;  %v1642_v6 = vld [vmem:[%s4825_s4 + $0x2a0] sm:$0xff] }
 0x27c   :  { %v1401_v11 = vcombine.low %v1252_v9, %v1280_v25  ;;  %v1285_v12 = vrot.slane %v1280_v25, 1  ;;  %v1374_v28 = vrot.slane %v1367_v4, %v3759_v8  ;;  %v1378_v63 = vrot.slane %v1339_v3, 1  ;;  %v1637_v25 = vld [vmem:[%s4825_s4 + $0x278] sm:$0xff] }
 0x27d   :  { %v3038_v9 = vpack.c.bf16 %v1633_v48, %v1631_v44 }
 0x27e   :  { %1351 = vrot.lane.b32.xlu1 %v1339_v3, %s3305_s19  ;;  %v1286_v16 = vsel %vm55_vm1, %v1284_v50, %v1285_v12  ;;  %v1379_v17 = vrot.slane %v1374_v28, 1  ;;  %v1635_v3 = vld [vmem:[%s4825_s4 + $0x268] sm:$0xff]  ;;  %v1236_v28 = vrot.slane %v4140_v53, %v3759_v8  ;;  %v1636_v53 = vld [vmem:[%s4825_s4 + $0x270] sm:$0xff] }
 0x27f   :  { %1291 = vrot.lane.b32.xlu0 %v1286_v16, %s3306_s20 }
 0x280   :  { %v1380_v54 = vsel %vm55_vm1, %v1378_v63, %v1379_v17  ;;  %vm1435_vm1 = vcmask 654336  }
 0x282   :  { %1413 = vrot.lane.b32.xlu1 %v1401_v11, %s3308_s27 }
 0x283   :  { %1385 = vrot.lane.b32.xlu0 %v1380_v54, %s3307_s23 }
 0x286   :  { %1293 = vrot.lane.b32.xlu1 %v1285_v12, %s3306_s20 }
 0x287   :  { %1383 = vrot.lane.b32.xlu0 %v1376_v30, %s3307_s23 }
 0x28a   :  { %1387 = vrot.lane.b32.xlu1 %v1379_v17, %s3307_s23 }
 0x28b   :  { %1353 = vrot.lane.b32.xlu0 %v1346_v5, %s3305_s19  ;;  %v3042_v5 = vpack.c.bf16 %v1637_v25, %v1635_v3  ;;  %v1646_v25 = vld [vmem:[%s4825_s4 + $0x2c0] sm:$0xff] }
 0x28e   :  { %1411 = vrot.lane.b32.xlu1 %v1400_v18, %s3308_s27  ;;  %v1634_v18 = vld [vmem:[%s4825_s4 + $0x260] sm:$0xff] }
 0x28f   :  { %1409 = vrot.lane.b32.xlu0 %v1393_v56, %s3308_s27 }
 0x293   :  { %1415 = vrot.lane.b32.xlu0 %v1408_v19, %s3308_s27 }
 0x2e1   :  { %v1348_v22 = vpop.permute.xlu0 %1347 }
 0x2e4   :  { %v1288_v62 = vpop.permute.xlu1 %1287 }
 0x2e5   :  { %v1426_v23 = vsel %vm1056_vm14, %v1288_v62, %v1348_v22  ;;  %v1422_v26 = vsel %vm1421_vm15, %v4155_v10, %v1288_v62  ;;  %v1290_v35 = vpop.permute.xlu0 %1289  ;;  %v1639_v62 = vld [vmem:[%s4825_s4 + $0x288] sm:$0xff]  ;;  %v1641_v22 = vld [vmem:[%s4825_s4 + $0x298] sm:$0xff] }
 0x2e6   :  { %v1423_v20 = vsel %vm1421_vm15, %v1236_v28, %v1290_v35  ;;  %v1648_v28 = vld [vmem:[%s4825_s4 + $0x2d0] sm:$0xff] }
 0x2e8   :  { %v4256_v24 = vpop.permute.xlu1 %1381 }
 0x2e9   :  { %v1431_v27 = vsel %vm1430_vm0, %v1426_v23, %v4256_v24 }
 0x2ea   :  { %v1452_v0 = vcombine.low %v1422_v26, %v1431_v27  ;;  %v1453_v30 = vcombine.high %v1422_v26, %v1431_v27 }
 0x2ec   :  { %v1462_v32 = vrot.slane %v1452_v0, %v3759_v8  ;;  %v1469_v56 = vrot.slane %v1453_v30, %v3759_v8  ;;  %v1350_v34 = vpop.permute.xlu1 %1349  ;;  %v3044_v0 = vpack.c.bf16 %v1636_v53, %v1634_v18  ;;  %v1260_v30 = vrot.slane %v4213_v15, %v3759_v8 }
 0x2ed   :  { %v1427_v16 = vsel %vm1056_vm14, %v1290_v35, %v1350_v34  ;;  %v1638_v34 = vld [vmem:[%s4825_s4 + $0x280] sm:$0xff]  ;;  %v1640_v35 = vld [vmem:[%s4825_s4 + $0x290] sm:$0xff] }
 0x2ee   :  { %v1686_v10 = vrot.slane %v1462_v32, %v3759_v8  ;;  %v1700_v31 = vrot.slane %v1469_v56, %v3759_v8  ;;  %v3046_v56 = vpack.c.bf16 %v1641_v22, %v1639_v62 }
 0x2f0   :  { %v1708_v41 = vcombine.low %v1686_v10, %v1700_v31  ;;  %v1709_v38 = vcombine.high %v1686_v10, %v1700_v31  ;;  %v1352_v39 = vpop.permute.xlu1 %1351 }
 0x2f1   :  { %v1292_v45 = vpop.permute.xlu0 %1291 }
 0x2f2   :  { %1852 = vmatprep.mubr.f32.mxu0 %v1709_v38  ;;  %v1428_v13 = vsel %vm1056_vm14, %v1292_v45, %v1352_v39  ;;  %v1424_v59 = vsel %vm1421_vm15, %v4224_v60, %v1292_v45  ;;  %v3040_v60 = vpack.c.bf16 %v1632_v57, %v1630_v7  ;;  %v3048_v39 = vpack.c.bf16 %v1640_v35, %v1638_v34  ;;  %v1644_v45 = vld [vmem:[%s4825_s4 + $0x2b0] sm:$0xff]  ;;  %v1647_v7 = vld [vmem:[%s4825_s4 + $0x2c8] sm:$0xff]  ;;  %v1649_v57 = vld [vmem:[%s4825_s4 + $0x2d8] sm:$0xff] }
 0x2f3   :  { %1853 = vmatmul.mubr.f32.vlgmr.msra.gmra.mrb[14].mxu0 %v1708_v41  ;;  %v3052_v3 = vpack.c.bf16 %v1644_v45, %v1642_v6 }
 0x2f4   :  { %3033 = vmatpush1.bf16.msra.mxu0 %v3032_v2  ;;  %v1414_v52 = vpop.permute.xlu1 %1413 }
 0x2f5   :  { %3035 = vmatprep.subr.bf16.mxu0 %v3034_v40  ;;  %v1386_v58 = vpop.permute.xlu0 %1385 }
 0x2f6   :  { %v1433_v61 = vsel %vm1430_vm0, %v1428_v13, %v1386_v58  ;;  %v1438_v4 = vsel %vm1435_vm1, %v1386_v58, %v1414_v52 }
 0x2f7   :  { %v1505_v11 = vcombine.low %v1424_v59, %v1433_v61  ;;  %v1506_v50 = vcombine.high %v1424_v59, %v1433_v61  ;;  %v1507_v12 = vcombine.low %v1438_v4, %v1414_v52  ;;  %v1508_v21 = vcombine.high %v1438_v4, %v1414_v52 }
 0x2f8   :  { %3037 = vmatpush1.bf16.msra.mxu0 %v3036_v51  ;;  %v1294_v63 = vpop.permute.xlu1 %1293 }
 0x2f9   :  { %3039 = vmatprep.subr.bf16.mxu0 %v3038_v9  ;;  %v1515_v17 = vrot.slane %v1505_v11, %v3759_v8  ;;  %v4312_v54 = vrot.slane %v1507_v12, %v3759_v8  ;;  %v4320_v19 = vpop.permute.xlu0 %1383  ;;  %v4332_v23 = vrot.slane %v1506_v50, %v3759_v8  ;;  %v4346_v10 = vrot.slane %v1508_v21, %v3759_v8 }
 0x2fa   :  { %v1432_v14 = vsel %vm1430_vm0, %v1427_v16, %v4320_v19  ;;  %v1425_v41 = vsel %vm1421_vm15, %v1260_v30, %v1294_v63  ;;  %v3054_v12 = vpack.c.bf16 %v1649_v57, %v1647_v7  ;;  %v1655_v30 = vld [vmem:[%s4825_s4 + $0x308] sm:$0xff] }
 0x2fb   :  { %v1538_v26 = vcombine.high %v1515_v17, %v4312_v54  ;;  %v1488_v27 = vcombine.low %v1423_v20, %v1432_v14  ;;  %v1540_v52 = vcombine.high %v4332_v23, %v4346_v10  ;;  %v3056_v20 = vpack.c.bf16 %v1648_v28, %v1646_v25  ;;  %v2070_v28 = vld [vmem:[%s4827_s6 + $0x48] sm:$0xff] }
 0x2fc   :  { %3041 = vmatpush1.bf16.msra.mxu0 %v3040_v60  ;;  %v1388_v31 = vpop.permute.xlu1 %1387  ;;  %v1651_v60 = vld [vmem:[%s4825_s4 + $0x2e8] sm:$0xff] }
 0x2fd   :  { %3043 = vmatprep.subr.bf16.mxu0 %v3042_v5  ;;  %v1496_v32 = vrot.slane %v1488_v27, %v3759_v8  ;;  %v1354_v1 = vpop.permute.xlu0 %1353  ;;  %v2787_v36 = vcombine.low %v1538_v26, %v4332_v23  ;;  %v1650_v26 = vld [vmem:[%s4825_s4 + $0x2e0] sm:$0xff]  ;;  %v1652_v27 = vld [vmem:[%s4825_s4 + $0x2f0] sm:$0xff] }
 0x2fe   :  { %v1429_v15 = vsel %vm1056_vm14, %v1294_v63, %v1354_v1  ;;  %v1653_v63 = vld [vmem:[%s4825_s4 + $0x2f8] sm:$0xff]  ;;  %v3060_v34 = vpack.c.bf16 %v1652_v27, %v1650_v26  ;;  %v1654_v1 = vld [vmem:[%s4825_s4 + $0x300] sm:$0xff]  ;;  %v2079_v27 = vld [vmem:[%s4827_s6 + $0x90] sm:$0xff] }
 0x2ff   :  { %v2785_v38 = vcombine.low %v1496_v32, %v1515_v17  ;;  %v1434_v2 = vsel %vm1430_vm0, %v1429_v15, %v1388_v31  ;;  %v1736_v51 = vrot.slane %v2787_v36, %v3759_v8  ;;  %v3058_v21 = vpack.c.bf16 %v1653_v63, %v1651_v60  ;;  %v1656_v36 = vld [vmem:[%s4825_s4 + $0x310] sm:$0xff]  ;;  %v1661_v15 = vld [vmem:[%s4825_s4 + $0x338] sm:$0xff] }
 0x300   :  { %3045 = vmatpush1.bf16.msra.mxu0 %v3044_v0  ;;  %v1541_v40 = vcombine.low %v1425_v41, %v1434_v2  ;;  %v1412_v16 = vpop.permute.xlu1 %1411  ;;  %v3064_v41 = vpack.c.bf16 %v1656_v36, %v1654_v1  ;;  %v1658_v2 = vld [vmem:[%s4825_s4 + $0x320] sm:$0xff]  ;;  %v2071_v63 = vld [vmem:[%s4827_s6 + $0x50] sm:$0xff] }
 0x301   :  { %3047 = vmatprep.subr.bf16.mxu0 %v3046_v56  ;;  %v1410_v44 = vpop.permute.xlu0 %1409  ;;  %v1722_v48 = vrot.slane %v2785_v38, %v3759_v8  ;;  %v1437_v62 = vsel %vm1435_vm1, %v4320_v19, %v1412_v16  ;;  %v1657_v19 = vld [vmem:[%s4825_s4 + $0x318] sm:$0xff] }
 0x302   :  { %v4368_v13 = vrot.slane %v1541_v40, %v3759_v8  ;;  %v1436_v9 = vsel %vm1435_vm1, %v4256_v24, %v1410_v44  ;;  %v1489_v32 = vcombine.low %v1437_v62, %v1412_v16  ;;  %v3062_v35 = vpack.c.bf16 %v1657_v19, %v1655_v30  ;;  %v2072_v16 = vld [vmem:[%s4827_s6 + $0x58] sm:$0xff]  ;;  %v2077_v62 = vld [vmem:[%s4827_s6 + $0x80] sm:$0xff] }
 0x303   :  { %v1454_v58 = vcombine.low %v1436_v9, %v1410_v44  ;;  %v1455_v59 = vcombine.high %v1436_v9, %v1410_v44  ;;  %v1745_v61 = vcombine.high %v1722_v48, %v1736_v51  ;;  %v1744_v4 = vcombine.low %v1722_v48, %v1736_v51  ;;  %v1663_v48 = vld [vmem:[%s4825_s4 + $0x348] sm:$0xf]  ;;  %v1664_v19 = vld [vmem:[%s4826_s5] sm:$0x3] }
 0x304   :  { %3049 = vmatpush1.bf16.msra.mxu0 %v3048_v39  ;;  %v2789_v24 = vcombine.low %v1540_v52, %v4368_v13  ;;  %v1503_v37 = vrot.slane %v1489_v32, %v3759_v8  ;;  %v1660_v39 = vld [vmem:[%s4825_s4 + $0x330] sm:$0xff]  ;;  %v1539_v40 = vcombine.low %v4332_v23, %v4346_v10  ;;  %v1662_v23 = vld [vmem:[%s4825_s4 + $0x340] sm:$0xf]  ;;  %v1669_v32 = vrot.slane %v1664_v19, %v3739_v47 }
 0x305   :  { %3051 = vmatprep.subr.bf16.mxu0 %v3050_v42  ;;  %v1476_v11 = vrot.slane %v1454_v58, %v3759_v8  ;;  %v1483_v50 = vrot.slane %v1455_v59, %v3759_v8  ;;  %1858 = vmatprep.mubr.f32.mxu0 %v1745_v61  ;;  %v1416_v17 = vpop.permute.xlu0 %1415  ;;  %v3068_v45 = vpack.c.bf16 %v1660_v39, %v1658_v2  ;;  %v2063_v58 = vld [vmem:[%s4827_s6 + $0x10] sm:$0xff]  ;;  %v2064_v59 = vld [vmem:[%s4827_s6 + $0x18] sm:$0xff] }
 0x306   :  { %1859 = vmatmul.mubr.f32.gmra.mrb[16].mxu0 %v1744_v4  ;;  %v1756_v5 = vrot.slane %v2789_v24, %v3759_v8  ;;  %v1439_v22 = vsel %vm1435_vm1, %v1388_v31, %v1416_v17  ;;  %v1659_v31 = vld [vmem:[%s4825_s4 + $0x328] sm:$0xff]  ;;  %v2786_v42 = vcombine.low %v1503_v37, %v4312_v54  ;;  %v2788_v44 = vcombine.high %v4312_v54, %v1539_v40  ;;  %v2065_v4 = vld [vmem:[%s4827_s6 + $0x20] sm:$0xff]  ;;  %v2067_v24 = vld [vmem:[%s4827_s6 + $0x30] sm:$0xff] }
 0x307   :  { %v1693_v18 = vrot.slane %v1476_v11, %v3759_v8  ;;  %v1707_v53 = vrot.slane %v1483_v50, %v3759_v8  ;;  %v1542_v56 = vcombine.low %v1439_v22, %v1416_v17  ;;  %v3066_v38 = vpack.c.bf16 %v1661_v15, %v1659_v31  ;;  %v2068_v11 = vld [vmem:[%s4827_s6 + $0x38] sm:$0xff]  ;;  %v2078_v22 = vld [vmem:[%s4827_s6 + $0x88] sm:$0xff] }
 0x308   :  { %3053 = vmatpush1.bf16.msra.mxu0 %v3052_v3  ;;  %v1764_v14 = vcombine.high %v1756_v5, %v1756_v5  ;;  %v1729_v51 = vrot.slane %v2786_v42, %v3759_v8  ;;  %v3074_v61 = vpack.c.bf16 %v2064_v59, %v2063_v58  ;;  %v2066_v3 = vld [vmem:[%s4827_s6 + $0x28] sm:$0xff]  ;;  %v3080_v50 = vpack.c.bf16 %v2068_v11, %v2067_v24 }
 0x309   :  { %3055 = vmatprep.subr.bf16.mxu0 %v3054_v12  ;;  %v1711_v0 = vcombine.high %v1693_v18, %v1707_v53  ;;  %v1556_v33 = vrot.slane %v1542_v56, %v3759_v8  ;;  %v1710_v9 = vcombine.low %v1693_v18, %v1707_v53  ;;  %v3077_v25 = vpack.c.bf16 %v2066_v3, %v2065_v4  ;;  %v2069_v12 = vld [vmem:[%s4827_s6 + $0x40] sm:$0xff]  ;;  %v2074_v18 = vld [vmem:[%s4827_s6 + $0x68] sm:$0xff] }
 0x30a   :  { %1864 = vmatprep.mubr.f32.mxu0 %v1764_v14  ;;  %3075 = vmatpush1.bf16.msra.mxu1 %v3074_v61  ;;  %v3083_v60 = vpack.c.bf16 %v2070_v28, %v2069_v12  ;;  %v3086_v17 = vpack.c.bf16 %v2072_v16, %v2071_v63  ;;  %v3095_v26 = vpack.c.bf16 %v2078_v22, %v2077_v62 }
 0x30b   :  { %1865 = vmatmul.mubr.f32.gmra.mrb[18].mxu0 %v1756_v5  ;;  %v1557_v6 = vcombine.low %v4368_v13, %v1556_v33  ;;  %v1743_v13 = vrot.slane %v2788_v44, %v3759_v8  ;;  %3076 = vmatprep.subr.bf16.mxu1 %v3302_v55  ;;  %v2073_v5 = vld [vmem:[%s4827_s6 + $0x60] sm:$0xff]  ;;  %v1673_v56 = vrot.slane %v1664_v19, %v284_v49 }
 0x30c   :  { %3057 = vmatpush1.bf16.msra.mxu0 %v3056_v20  ;;  %2793 = vmatprep.mubr.msk.f32.mxu0 %vm1775_vm2, %v1711_v0  ;;  %v3089_v53 = vpack.c.bf16 %v2074_v18, %v2073_v5  ;;  %v2075_v20 = vld [vmem:[%s4827_s6 + $0x70] sm:$0xff]  ;;  %v2080_v0 = vld [vmem:[%s4827_s6 + $0x98] sm:$0xff] }
 0x30d   :  { %3059 = vmatprep.subr.bf16.mxu0 %v3058_v21  ;;  %v2790_v52 = vcombine.high %v4346_v10, %v1557_v6  ;;  %v1747_v54 = vcombine.high %v1729_v51, %v1743_v13  ;;  %v1746_v10 = vcombine.low %v1729_v51, %v1743_v13  ;;  %v2076_v21 = vld [vmem:[%s4827_s6 + $0x78] sm:$0xff]  ;;  %v3098_v30 = vpack.c.bf16 %v2080_v0, %v2079_v27 }
 0x30e   :  { %3078 = vmatpush1.bf16.msra.mxu1 %v3077_v25  ;;  %v3092_v14 = vpack.c.bf16 %v2076_v21, %v2075_v20 }
 0x30f   :  { %v1763_v7 = vrot.slane %v2790_v52, %v3759_v8  ;;  %3079 = vmatprep.subr.bf16.mxu1 %v3302_v55 }
 0x310   :  { %3061 = vmatpush1.bf16.msra.mxu0 %v3060_v34 }
 0x311   :  { %3063 = vmatprep.subr.bf16.mxu0 %v3062_v35  ;;  %v1765_v57 = vcombine.high %v1763_v7, %v1763_v7 }
 0x312   :  { %3081 = vmatpush1.bf16.msra.mxu1 %v3080_v50 }
 0x313   :  { %3082 = vmatprep.subr.bf16.mxu1 %v3302_v55 }
 0x314   :  { %3065 = vmatpush1.bf16.msra.mxu0 %v3064_v41 }
 0x315   :  { %3067 = vmatprep.subr.bf16.mxu0 %v3066_v38 }
 0x316   :  { %3084 = vmatpush1.bf16.msra.mxu1 %v3083_v60 }
 0x317   :  { %3085 = vmatprep.subr.bf16.mxu1 %v3302_v55 }
 0x318   :  { %3069 = vmatpush1.bf16.msra.mxu0 %v3068_v45 }
 0x319   :  { %2791 = vmatprep.subr.msk.mxu0 %vm172_vm3, %v1663_v48 }
 0x31a   :  { %3087 = vmatpush1.bf16.msra.mxu1 %v3086_v17 }
 0x31b   :  { %3088 = vmatprep.subr.bf16.mxu1 %v3302_v55 }
 0x31c   :  { %2792 = vmatpush1.msk.msra.mxu0 %vm172_vm3, %v1662_v23  ;;  %vm2403_vm3 = vcmask 916480  }
 0x31d   :  { %1936 = vmatmul.mubr.f32.vlgmr.msra.gmra.mrb[14].mxu0 %v1710_v9  ;;  %3159 = vmatprep.subr.bf16.mxu0 %v3302_v55 }
 0x31e   :  { %2794 = vmatprep.mubr.msk.f32.mxu0 %vm1775_vm2, %v1747_v54  ;;  %3090 = vmatpush1.bf16.msra.mxu1 %v3089_v53 }
 0x31f   :  { %3091 = vmatprep.subr.bf16.mxu1 %v3302_v55 }
 0x321   :  { %1942 = vmatmul.mubr.f32.gmra.mrb[16].mxu0 %v1746_v10 }
 0x322   :  { %2795 = vmatprep.mubr.msk.f32.mxu0 %vm1775_vm2, %v1765_v57  ;;  %3093 = vmatpush1.bf16.msra.mxu1 %v3092_v14 }
 0x323   :  { %3094 = vmatprep.subr.bf16.mxu1 %v3302_v55 }
 0x325   :  { %1948 = vmatmul.mubr.f32.gmra.mrb[18].mxu0 %v1763_v7 }
 0x326   :  { %3096 = vmatpush1.bf16.msra.mxu1 %v3095_v26 }
 0x327   :  { %3097 = vmatprep.subr.bf16.mxu1 %v3302_v55 }
 0x32a   :  { %3099 = vmatpush1.bf16.msra.mxu1 %v3098_v30 }
 0x3f0   :  { %v1937_v34 = vpop.f32.mrb[14].mxu0 }
 0x3f1   :  { %v3180_v35 = vadd.f32 %v1937_v34, %v1669_v32  ;;  %v1939_v1 = vpop.f32.mrb[15].mxu0 }
 0x3f2   :  { %v3181_v36 = vadd.f32 %v1939_v1, %v1673_v56 }
 0x3f3   :  { %3259 = vtanh.f32 %v3180_v35 }
 0x3f4   :  { %3261 = vtanh.f32 %v3181_v36  ;;  %v1943_v31 = vpop.f32.mrb[16].mxu0 }
 0x3f5   :  { %v3182_v15 = vadd.f32 %v1943_v31, %v1669_v32  ;;  %v1945_v37 = vpop.f32.mrb[17].mxu0 }
 0x3f6   :  { %v3183_v33 = vadd.f32 %v1945_v37, %v1673_v56 }
 0x3f7   :  { %3263 = vtanh.f32 %v3182_v15 }
 0x3f8   :  { %3265 = vtanh.f32 %v3183_v33  ;;  %v1949_v41 = vpop.f32.mrb[18].mxu0 }
 0x3f9   :  { %v3184_v38 = vadd.f32 %v1949_v41, %v1669_v32  ;;  %v1951_v2 = vpop.f32.mrb[19].mxu0 }
 0x3fa   :  { %v3185_v39 = vadd.f32 %v1951_v2, %v1673_v56 }
 0x3fb   :  { %3267 = vtanh.f32 %v3184_v38 }
 0x3fc   :  { %3269 = vtanh.f32 %v3185_v39 }
 0x3fd   :  { %v3260_v40 = vpop.eup %3259 }
 0x3fe   :  { %v3262_v49 = vpop.eup %3261 }
 0x3ff   :  { %v1966_v42 = vcombine.low %v3260_v40, %v3262_v49  ;;  %v1967_v6 = vcombine.high %v3260_v40, %v3262_v49 }
 0x401   :  { %v3264_v45 = vpop.eup %3263  ;;  %v1974_v44 = vrot.slane %v1966_v42, %v3759_v8  ;;  %v1981_v48 = vrot.slane %v1967_v6, %v3759_v8 }
 0x402   :  { %v3266_v51 = vpop.eup %3265 }
 0x403   :  { %v1982_v52 = vcombine.high %v1974_v44, %v1974_v44  ;;  %v1983_v23 = vcombine.high %v1981_v48, %v1981_v48  ;;  %v2796_v13 = vrot.slane %v1974_v44, 9  ;;  %v2798_v9 = vrot.slane %v1981_v48, 9 }
 0x404   :  { %v1984_v54 = vcombine.low %v3264_v45, %v3266_v51  ;;  %v1985_v7 = vcombine.high %v3264_v45, %v3266_v51 }
 0x405   :  { %v3268_v10 = vpop.eup %3267  ;;  %v2797_v57 = vrot.slane %v1982_v52, 9  ;;  %v2799_v58 = vrot.slane %v1983_v23, 9  ;;  %v2051_v59 = vadd.f32 %v2796_v13, %v1974_v44  ;;  %v2053_v24 = vadd.f32 %v2798_v9, %v1981_v48 }
 0x406   :  { %v3270_v61 = vpop.eup %3269  ;;  %v1992_v4 = vrot.slane %v1984_v54, %v3759_v8  ;;  %v1999_v3 = vrot.slane %v1985_v7, %v3759_v8 }
 0x407   :  { %v2052_v25 = vadd.f32 %v2797_v57, %v1982_v52  ;;  %v2002_v50 = vcombine.low %v3268_v10, %v3270_v61  ;;  %v2098_v60 = vrot.slane %v2051_v59, %v3766_v29  ;;  %v2054_v16 = vadd.f32 %v2799_v58, %v1983_v23  ;;  %v2424_v61 = vld [vmem:[%s4828_s7 + $0x80] sm:$0xff] }
 0x408   :  { %v2800_v11 = vrot.slane %v1992_v4, 9  ;;  %v2000_v12 = vcombine.high %v1992_v4, %v1992_v4  ;;  %v2001_v28 = vcombine.high %v1999_v3, %v1999_v3  ;;  %v2802_v63 = vrot.slane %v1999_v3, 9 }
 0x409   :  { %v2106_v17 = vrot.slane %v2052_v25, %v3766_v29  ;;  %v2102_v5 = vrot.slane %v2052_v25, %v3739_v47  ;;  %v2009_v21 = vrot.slane %v2002_v50, %v3759_v8  ;;  %v2114_v62 = vrot.slane %v2053_v24, %v3766_v29  ;;  %v2409_v25 = vld [vmem:[%s4828_s7 + $0x8] sm:$0xff] }
 0x40a   :  { %v2801_v18 = vrot.slane %v2000_v12, 9  ;;  %v2803_v53 = vrot.slane %v2001_v28, 9  ;;  %v2055_v20 = vadd.f32 %v2800_v11, %v1992_v4  ;;  %v2057_v14 = vadd.f32 %v2802_v63, %v1999_v3  ;;  %v2408_v4 = vld [vmem:[%s4828_s7] sm:$0xff]  ;;  %v2427_v11 = vld [vmem:[%s4828_s7 + $0x98] sm:$0xff] }
 0x40b   :  { %v2178_v22 = vsel %vm997_vm7, %v2106_v17, %v2098_v60  ;;  %v2122_v0 = vrot.slane %v2054_v16, %v3766_v29  ;;  %v2094_v19 = vrot.slane %v2051_v59, %v3739_v47  ;;  %v2110_v32 = vrot.slane %v2053_v24, %v3739_v47  ;;  %v2426_v24 = vld [vmem:[%s4828_s7 + $0x90] sm:$0xff]  ;;  %v2411_v60 = vld [vmem:[%s4828_s7 + $0x18] sm:$0xff]  ;;  %v2428_v63 = vld [vmem:[%s4828_s7 + $0xa0] sm:$0xff] }
 0x40c   :  { %v2056_v26 = vadd.f32 %v2801_v18, %v2000_v12  ;;  %v2058_v27 = vadd.f32 %v2803_v53, %v2001_v28  ;;  %v2130_v30 = vrot.slane %v2055_v20, %v3766_v29  ;;  %v2179_v56 = vsel %vm999_vm8, %v2114_v62, %v2178_v22  ;;  %v2410_v28 = vld [vmem:[%s4828_s7 + $0x10] sm:$0xff]  ;;  %v2412_v18 = vld [vmem:[%s4828_s7 + $0x20] sm:$0xff]  ;;  %v2413_v53 = vld [vmem:[%s4828_s7 + $0x28] sm:$0xff] }
 0x40d   :  { %v2118_v34 = vrot.slane %v2054_v16, %v3739_v47  ;;  %v2146_v35 = vrot.slane %v2057_v14, %v3766_v29  ;;  %v2180_v1 = vsel %vm1001_vm9, %v2122_v0, %v2179_v56  ;;  %v2126_v36 = vrot.slane %v2055_v20, %v3739_v47  ;;  %v2429_v16 = vld [vmem:[%s4828_s7 + $0xa8] sm:$0xff]  ;;  %v2430_v20 = vld [vmem:[%s4828_s7 + $0xb0] sm:$0xff] }
 0x40e   :  { %v2138_v8 = vrot.slane %v2056_v26, %v3766_v29  ;;  %v2181_v31 = vsel %vm1003_vm10, %v2130_v30, %v2180_v1  ;;  %v2134_v15 = vrot.slane %v2056_v26, %v3739_v47  ;;  %v2171_v37 = vsel %vm997_vm7, %v2102_v5, %v2094_v19  ;;  %v2414_v22 = vld [vmem:[%s4828_s7 + $0x30] sm:$0xff]  ;;  %v2415_v26 = vld [vmem:[%s4828_s7 + $0x38] sm:$0xff]  ;;  %v2433_v0 = vld [vmem:[%s4828_s7 + $0xc8] sm:$0xff] }
 0x40f   :  { %v2010_v33 = vcombine.high %v2009_v21, %v2009_v21  ;;  %v2154_v41 = vrot.slane %v2058_v27, %v3766_v29  ;;  %v2172_v2 = vsel %vm999_vm8, %v2110_v32, %v2171_v37  ;;  %v2804_v39 = vrot.slane %v2009_v21, 9  ;;  %v2416_v32 = vld [vmem:[%s4828_s7 + $0x40] sm:$0xff]  ;;  %v2417_v56 = vld [vmem:[%s4828_s7 + $0x48] sm:$0xff] }
 0x410   :  { %v2182_v38 = vsel %vm1005_vm11, %v2138_v8, %v2181_v31  ;;  %v2173_v49 = vsel %vm1001_vm9, %v2118_v34, %v2172_v2  ;;  %v2142_v45 = vrot.slane %v2057_v14, %v3739_v47  ;;  %v2150_v51 = vrot.slane %v2058_v27, %v3739_v47  ;;  %v2432_v27 = vld [vmem:[%s4828_s7 + $0xc0] sm:$0xff]  ;;  %v2434_v34 = vld [vmem:[%s4828_s7 + $0xd0] sm:$0xff]  ;;  %v2435_v8 = vld [vmem:[%s4828_s7 + $0xd8] sm:$0xff] }
 0x411   :  { %v2183_v40 = vsel %vm1007_vm12, %v2146_v35, %v2182_v38  ;;  %v2805_v42 = vrot.slane %v2010_v33, 9  ;;  %v2174_v44 = vsel %vm1003_vm10, %v2126_v36, %v2173_v49  ;;  %v2059_v48 = vadd.f32 %v2804_v39, %v2009_v21  ;;  %v2431_v21 = vld [vmem:[%s4828_s7 + $0xb8] sm:$0xff]  ;;  %v2418_v36 = vld [vmem:[%s4828_s7 + $0x50] sm:$0xff]  ;;  %v2436_v39 = vld [vmem:[%s4828_s7 + $0xe0] sm:$0xff] }
 0x412   :  { %v2184_v6 = vsel %vm1009_vm13, %v2154_v41, %v2183_v40  ;;  %v2175_v52 = vsel %vm1005_vm11, %v2134_v15, %v2174_v44  ;;  %v3102_v50 = vpack.c.bf16 %v2409_v25, %v2408_v4  ;;  %v3104_v12 = vpack.c.bf16 %v2427_v11, %v2426_v24  ;;  %v2419_v31 = vld [vmem:[%s4828_s7 + $0x58] sm:$0xff]  ;;  %v2437_v40 = vld [vmem:[%s4828_s7 + $0xe8] sm:$0xff]  ;;  %v2420_v44 = vld [vmem:[%s4828_s7 + $0x60] sm:$0xff] }
 0x413   :  { %2806 = vmatprep.mubr.msk.f32.mxu1 %vm187_vm4, %v2184_v6  ;;  %v2060_v23 = vadd.f32 %v2805_v42, %v2010_v33  ;;  %v2176_v13 = vsel %vm1007_vm12, %v2142_v45, %v2175_v52  ;;  %v2162_v54 = vrot.slane %v2059_v48, %v3766_v29  ;;  %v2158_v58 = vrot.slane %v2059_v48, %v3739_v47 }
 0x414   :  { %v2177_v9 = vsel %vm1009_vm13, %v2150_v51, %v2176_v13  ;;  %v3106_v17 = vpack.c.bf16 %v2411_v60, %v2410_v28  ;;  %v3108_v5 = vpack.c.bf16 %v2429_v16, %v2428_v63  ;;  %v3110_v14 = vpack.c.bf16 %v2413_v53, %v2412_v18 }
 0x415   :  { %v2170_v7 = vrot.slane %v2060_v23, %v3766_v29  ;;  %v2166_v10 = vrot.slane %v2060_v23, %v3739_v47  ;;  %2258 = vmatmul.mubr.f32.vlgmr.msra.gmra.mrb[8].mxu1 %v2177_v9  ;;  %v2425_v29 = vld [vmem:[%s4828_s7 + $0x88] sm:$0xff]  ;;  %v3112_v62 = vpack.c.bf16 %v2431_v21, %v2430_v20  ;;  %v3114_v30 = vpack.c.bf16 %v2415_v26, %v2414_v22  ;;  %v2438_v9 = vld [vmem:[%s4828_s7 + $0xf0] sm:$0xff] }
 0x416   :  { %v3100_v3 = vpack.c.bf16 %v2425_v29, %v2424_v61  ;;  %v3116_v19 = vpack.c.bf16 %v2433_v0, %v2432_v27  ;;  %v3118_v35 = vpack.c.bf16 %v2417_v56, %v2416_v32  ;;  %v3120_v1 = vpack.c.bf16 %v2435_v8, %v2434_v34  ;;  %v2423_v61 = vld [vmem:[%s4828_s7 + $0x78] sm:$0xff] }
 0x417   :  { %v2186_v57 = vsel %vm997_vm7, %v2170_v7, %v2162_v54  ;;  %v2185_v59 = vsel %vm997_vm7, %v2166_v10, %v2158_v58  ;;  %v3122_v15 = vpack.c.bf16 %v2419_v31, %v2418_v36  ;;  %v3309_v37 = vmov 1966171168   ;;  %v2439_v54 = vld [vmem:[%s4828_s7 + $0xf8] sm:$0xff] }
 0x418   :  { %2807 = vmatprep.mubr.msk.f32.mxu1 %vm187_vm4, %v2186_v57  ;;  %3101 = vmatprep.subr.bf16.mxu1 %v3100_v3  ;;  %v2272_v33 = vunpack.c.l.s4 %v3309_v37  ;;  %v3124_v45 = vpack.c.bf16 %v2437_v40, %v2436_v39  ;;  %v3128_v4 = vpack.c.bf16 %v2439_v54, %v2438_v9  ;;  %v2448_v54 = vld [vmem:[%s4828_s7 + $0x140] sm:$0xff] }
 0x419   :  { %2263 = vmatmul.mubr.f32.gmra.mrb[10].mxu1 %v2185_v59  ;;  %v2422_v59 = vld [vmem:[%s4828_s7 + $0x70] sm:$0xff] }
 0x41a   :  { %3103 = vmatpush3.bf16.msra.mxu1 %v3102_v50  ;;  %v2273_v41 = vunpack.c.0.s8 %v2272_v33  ;;  %v3130_v3 = vpack.c.bf16 %v2423_v61, %v2422_v59  ;;  %v2452_v61 = vld [vmem:[%s4828_s7 + $0x160] sm:$0xff] }
 0x41b   :  { %3105 = vmatprep.subr.bf16.mxu1 %v3104_v12 }
 0x41c   :  { %v2276_v38 = vsub.s32 %v2273_v41, %v3736_v46  ;;  %v2421_v46 = vld [vmem:[%s4828_s7 + $0x68] sm:$0xff] }
 0x41d   :  { %v3126_v48 = vpack.c.bf16 %v2421_v46, %v2420_v44 }
 0x41e   :  { %3107 = vmatpush3.bf16.msra.mxu1 %v3106_v17 }
 0x41f   :  { %3109 = vmatprep.subr.bf16.mxu1 %v3108_v5 }
 0x422   :  { %3111 = vmatpush3.bf16.msra.mxu1 %v3110_v14 }
 0x423   :  { %3113 = vmatprep.subr.bf16.mxu1 %v3112_v62 }
 0x426   :  { %3115 = vmatpush3.bf16.msra.mxu1 %v3114_v30 }
 0x427   :  { %3117 = vmatprep.subr.bf16.mxu1 %v3116_v19 }
 0x42a   :  { %3119 = vmatpush3.bf16.msra.mxu1 %v3118_v35 }
 0x42b   :  { %3121 = vmatprep.subr.bf16.mxu1 %v3120_v1  ;;  %v2441_v1 = vld [vmem:[%s4828_s7 + $0x108] sm:$0xff] }
 0x42e   :  { %3123 = vmatpush3.bf16.msra.mxu1 %v3122_v15 }
 0x42f   :  { %3125 = vmatprep.subr.bf16.mxu1 %v3124_v45 }
 0x432   :  { %3127 = vmatpush3.bf16.msra.mxu1 %v3126_v48  ;;  %v2444_v48 = vld [vmem:[%s4828_s7 + $0x120] sm:$0xff] }
 0x433   :  { %3129 = vmatprep.subr.bf16.mxu1 %v3128_v4 }
 0x436   :  { %3131 = vmatpush3.bf16.msra.mxu1 %v3130_v3  ;;  %v2454_v3 = vld [vmem:[%s4828_s7 + $0x170] sm:$0xff] }
 0x437   :  { %3132 = vmatprep.subr.bf16.mxu1 %v3302_v55 }
 0x4e8   :  { %v2259_v2 = vpop.f32.mrb[8].mxu1 }
 0x4e9   :  { %v2270_v49 = vcombine.high %v2259_v2, %v2259_v2  ;;  %v2277_v42 = vrot.slane %v2259_v2, %v2276_v38  ;;  %v2261_v6 = vpop.f32.mrb[9].mxu1 }
 0x4eb   :  { %v2284_v51 = vrot.slane %v2270_v49, %v2276_v38  ;;  %v2285_v52 = vcombine.high %v2277_v42, %v2277_v42  ;;  %v4648_v23 = vrot.slane %v2277_v42, %v2276_v38  ;;  %v2442_v49 = vld [vmem:[%s4828_s7 + $0x110] sm:$0xff]  ;;  %v2443_v42 = vld [vmem:[%s4828_s7 + $0x118] sm:$0xff] }
 0x4ec   :  { %v2264_v13 = vpop.f32.mrb[10].mxu1  ;;  %v3136_v46 = vpack.c.bf16 %v2443_v42, %v2442_v49 }
 0x4ed   :  { %v2286_v7 = vcombine.high %v2284_v51, %v2284_v51  ;;  %v2300_v10 = vrot.slane %v2284_v51, %v2276_v38  ;;  %v2307_v57 = vrot.slane %v2285_v52, %v2276_v38  ;;  %v2266_v58 = vpop.f32.mrb[11].mxu1  ;;  %v2315_v29 = vcombine.high %v4648_v23, %v4648_v23  ;;  %v2445_v51 = vld [vmem:[%s4828_s7 + $0x128] sm:$0xff] }
 0x4ee   :  { %v2325_v11 = vrot.slane %v2264_v13, %v2276_v38  ;;  %v3139_v52 = vpack.c.bf16 %v2445_v51, %v2444_v48  ;;  %v2447_v13 = vld [vmem:[%s4828_s7 + $0x138] sm:$0xff] }
 0x4ef   :  { %v2314_v25 = vrot.slane %v2286_v7, %v2276_v38  ;;  %v2316_v24 = vcombine.high %v2300_v10, %v2300_v10  ;;  %v2346_v50 = vrot.slane %v2307_v57, %v3739_v47  ;;  %v2360_v60 = vrot.slane %v2315_v29, %v3739_v47  ;;  %v2449_v7 = vld [vmem:[%s4828_s7 + $0x148] sm:$0xff]  ;;  %v2451_v58 = vld [vmem:[%s4828_s7 + $0x158] sm:$0xff] }
 0x4f0   :  { %v2326_v63 = vcombine.high %v2325_v11, %v2325_v11  ;;  %v2333_v16 = vrot.slane %v2325_v11, %v2276_v38  ;;  %v2317_v53 = vcombine.high %v2307_v57, %v2307_v57  ;;  %v2388_v22 = vrot.slane %v2300_v10, %v3739_v47  ;;  %v2450_v57 = vld [vmem:[%s4828_s7 + $0x150] sm:$0xff]  ;;  %v2453_v29 = vld [vmem:[%s4828_s7 + $0x168] sm:$0xff]  ;;  %v2456_v11 = vld [vmem:[%s4828_s7 + $0x180] sm:$0xff] }
 0x4f1   :  { %v2350_v12 = vrot.slane %v2316_v24, %v3739_v47  ;;  %v2318_v28 = vcombine.high %v2314_v25, %v2314_v25  ;;  %v3145_v10 = vpack.c.bf16 %v2449_v7, %v2448_v54  ;;  %v3148_v59 = vpack.c.bf16 %v2451_v58, %v2450_v57 }
 0x4f2   :  { %v2340_v20 = vrot.slane %v2326_v63, %v2276_v38  ;;  %v2378_v21 = vrot.slane %v2333_v16, %v3739_v47  ;;  %v2374_v14 = vrot.slane %v2317_v53, %v3739_v47  ;;  %v3151_v4 = vpack.c.bf16 %v2453_v29, %v2452_v61 }
 0x4f3   :  { %v3221_v17 = vpack.i.bf16 %v2346_v50, %v2350_v12  ;;  %v2364_v5 = vrot.slane %v2318_v28, %v3739_v47  ;;  %v2457_v50 = vld [vmem:[%s4828_s7 + $0x188] sm:$0xff] }
 0x4f4   :  { %v2392_v62 = vrot.slane %v2340_v20, %v3739_v47  ;;  %v2440_v47 = vld [vmem:[%s4828_s7 + $0x100] sm:$0xff]  ;;  %v3157_v28 = vpack.c.bf16 %v2457_v50, %v2456_v11  ;;  %v2629_v20 = vld [vmem:[%s4830_s9 + $0x18] sm:$0xff] }
 0x4f5   :  { %3222 = vrot.lane.b32.xlu1 %v3221_v17, %s3308_s27  ;;  %v3226_v18 = vpack.i.bf16 %v2360_v60, %v2364_v5  ;;  %v3133_v38 = vpack.c.bf16 %v2441_v1, %v2440_v47  ;;  %v2626_v17 = vld [vmem:[%s4830_s9] sm:$0xff]  ;;  %v2627_v5 = vld [vmem:[%s4830_s9 + $0x8] sm:$0xff] }
 0x4f6   :  { %v3160_v53 = vpack.c.bf16 %v2627_v5, %v2626_v17  ;;  %v2639_v47 = vld [vmem:[%s4830_s9 + $0x68] sm:$0xff] }
 0x4f7   :  { %3227 = vrot.lane.b32.xlu0 %v3226_v18, %s3300_s26  ;;  %v2628_v18 = vld [vmem:[%s4830_s9 + $0x10] sm:$0xff] }
 0x4f8   :  { %3161 = vmatpush3.bf16.msra.mxu0 %v3160_v53 }
 0x4f9   :  { %2381 = vrot.lane.b32.xlu1 %v2378_v21, %s3310_s1  ;;  %v3163_v21 = vpack.c.bf16 %v2629_v20, %v2628_v18  ;;  %3162 = vmatprep.subr.bf16.mxu0 %v3302_v55 }
 0x4fb   :  { %2379 = vrot.lane.b32.xlu0 %v2374_v14, %s3310_s1  ;;  %v2630_v14 = vld [vmem:[%s4830_s9 + $0x20] sm:$0xff] }
 0x4fc   :  { %3164 = vmatpush3.bf16.msra.mxu0 %v3163_v21 }
 0x4fd   :  { %2395 = vrot.lane.b32.xlu1 %v2392_v62, %s3301_s24  ;;  %v2631_v62 = vld [vmem:[%s4830_s9 + $0x28] sm:$0xff]  ;;  %3165 = vmatprep.subr.bf16.mxu0 %v3302_v55 }
 0x4ff   :  { %2393 = vrot.lane.b32.xlu0 %v2388_v22, %s3301_s24  ;;  %v3166_v22 = vpack.c.bf16 %v2631_v62, %v2630_v14 }
 0x501   :  { %3167 = vmatpush3.bf16.msra.mxu0 %v3166_v22 }
 0x502   :  { %3168 = vmatprep.subr.bf16.mxu0 %v3302_v55 }
 0x567   :  { %v3223_v26 = vpop.permute.xlu1 %3222 }
 0x568   :  { %v3224_v27 = vunpack.i.l.bf16 %v3223_v26  ;;  %v3225_v30 = vunpack.i.h.bf16 %v3223_v26  ;;  %v2632_v26 = vld [vmem:[%s4830_s9 + $0x30] sm:$0xff] }
 0x569   :  { %v3228_v0 = vpop.permute.xlu0 %3227 }
 0x56a   :  { %v2400_v19 = vsel %vm1435_vm1, %v2314_v25, %v3224_v27  ;;  %v3230_v32 = vunpack.i.h.bf16 %v3228_v0  ;;  %v3229_v56 = vunpack.i.l.bf16 %v3228_v0  ;;  %v2399_v2 = vsel %vm1435_vm1, %v4648_v23, %v3225_v30  ;;  %v2446_v23 = vld [vmem:[%s4828_s7 + $0x130] sm:$0xff]  ;;  %v2455_v25 = vld [vmem:[%s4828_s7 + $0x178] sm:$0xff] }
 0x56b   :  { %v2382_v34 = vpop.permute.xlu1 %2381  ;;  %v2471_v36 = vrot.slane %v2400_v19, 7  ;;  %v3142_v9 = vpack.c.bf16 %v2447_v13, %v2446_v23  ;;  %v3154_v24 = vpack.c.bf16 %v2455_v25, %v2454_v3  ;;  %v2635_v19 = vld [vmem:[%s4830_s9 + $0x48] sm:$0xff] }
 0x56c   :  { %v2402_v8 = vsel %vm187_vm4, %v3224_v27, %v3229_v56  ;;  %v2401_v35 = vsel %vm187_vm4, %v3225_v30, %v3230_v32  ;;  %vm2482_vm4 = vcmask 130048   ;;  %v2633_v27 = vld [vmem:[%s4830_s9 + $0x38] sm:$0xff]  ;;  %v2634_v30 = vld [vmem:[%s4830_s9 + $0x40] sm:$0xff]  ;;  %v2636_v56 = vld [vmem:[%s4830_s9 + $0x50] sm:$0xff] }
 0x56d   :  { %v2405_v31 = vsel %vm2403_vm3, %v2402_v8, %v2382_v34  ;;  %v2380_v15 = vpop.permute.xlu0 %2379  ;;  %v2472_v45 = vsel %vm997_vm7, %v2471_v36, %v2399_v2  ;;  %v3169_v0 = vpack.c.bf16 %v2633_v27, %v2632_v26  ;;  %v3172_v32 = vpack.c.bf16 %v2635_v19, %v2634_v30  ;;  %v2638_v8 = vld [vmem:[%s4830_s9 + $0x60] sm:$0xff]  ;;  %v2640_v36 = vld [vmem:[%s4830_s9 + $0x70] sm:$0xff] }
 0x56e   :  { %v2473_v37 = vrot.slane %v2405_v31, 7  ;;  %v2404_v33 = vsel %vm2403_vm3, %v2401_v35, %v2380_v15  ;;  %v3178_v1 = vpack.c.bf16 %v2639_v47, %v2638_v8 }
 0x56f   :  { %v2396_v41 = vpop.permute.xlu1 %2395  ;;  %3170 = vmatpush3.bf16.msra.mxu0 %v3169_v0 }
 0x570   :  { %v2477_v39 = vrot.slane %v2396_v41, 7  ;;  %v2474_v40 = vsel %vm997_vm7, %v2473_v37, %v2404_v33  ;;  %v2407_v12 = vsel %vm196_vm5, %v2382_v34, %v2396_v41  ;;  %3171 = vmatprep.subr.bf16.mxu0 %v3302_v55  ;;  %v2637_v34 = vld [vmem:[%s4830_s9 + $0x58] sm:$0xff]  ;;  %v2808_v33 = vld [vmem:[%s4829_s8] ss:$0 sm:$0xff]  ;;  %s3312_s9 = smov [#allocation2]  }
 0x571   :  { %v2394_v6 = vpop.permute.xlu0 %2393  ;;  %2549 = vmatprep.mubr.f32.mxu1 %v2474_v40  ;;  %v2475_v60 = vrot.slane %v2407_v12, 7  ;;  %v3175_v35 = vpack.c.bf16 %v2637_v34, %v2636_v56  ;;  %s2730_s14 = sshll.u32 %s3312_s9, 4  ;;  %s2731_s14 = int_to_ptr.vmem [resolvable:$true] %s2730_s14 }
 0x572   :  { %v2478_v44 = vsel %vm997_vm7, %v2477_v39, %v2394_v6  ;;  %2550 = vmatmul.mubr.f32.vlgmr.msra.gmra.mrb[12].mxu1 %v2472_v45  ;;  %v2406_v63 = vsel %vm196_vm5, %v2380_v15, %v2394_v6  ;;  %vm3311_vm5 = vmmov 0   ;;  %s3275_s8 = scalar_lea.vmem %s2731_s14, 32  ;;  %p3280_p1 = scmp.lt.s32.totalorder %s2731_s14, %s2731_s14 }
 0x573   :  { %3134 = vmatpush1.bf16.msra.mxu1 %v3133_v38  ;;  %2809 = vmatprep.mubr.msk.f32.mxu1 %vm2482_vm4, %v2478_v44  ;;  %v2476_v16 = vsel %vm997_vm7, %v2475_v60, %v2406_v63  ;;  %p3276_p0 = scmp.ne.s32.totalorder %s2731_s14, %s3275_s8  ;;  %p3281_p2 = scmp.lt.s32.totalorder %s3275_s8, %s3275_s8 }
 0x574   :  { %3135 = vmatprep.subr.bf16.mxu1 %v3302_v55  ;;  %3173 = vmatpush3.bf16.msra.mxu0 %v3172_v32 }
 0x575   :  { %3174 = vmatprep.subr.bf16.mxu0 %v3302_v55  ;;  %2893 = vmatprep.mubr.msk.f32.mxu0 %vm3311_vm5, %v3303_v43  ;;  %p3282_p3 = por %p3281_p2, %p3280_p1 }
 0x577   :  { %3137 = vmatpush1.bf16.msra.mxu1 %v3136_v46  ;;  %p3283_p4 = pnand %p3282_p3, %p3276_p0 }
 0x578   :  { %3138 = vmatprep.subr.bf16.mxu1 %v3302_v55  ;;  %3176 = vmatpush3.bf16.msra.mxu0 %v3175_v35 }
 0x579   :  { %3177 = vmatprep.subr.bf16.mxu0 %v3302_v55 }
 0x57b   :  { %3140 = vmatpush1.bf16.msra.mxu1 %v3139_v52 }
 0x57c   :  { %3141 = vmatprep.subr.bf16.mxu1 %v3302_v55  ;;  %3179 = vmatpush3.bf16.msra.mxu0 %v3178_v1 }
 0x57d   :  { %2891 = vmatprep.subr.mxu0 %v3303_v43  ;;  %v2810_v43 = vld [vmem:[%s4831_s10] ss:$0 sm:$0xff] }
 0x57f   :  { %3143 = vmatpush1.bf16.msra.mxu1 %v3142_v9 }
 0x580   :  { %3144 = vmatprep.subr.bf16.mxu1 %v3302_v55  ;;  %2892 = vmatpush3.msra.mxu0 %v2640_v36 }
 0x583   :  { %3146 = vmatpush1.bf16.msra.mxu1 %v3145_v10 }
 0x584   :  { %3147 = vmatprep.subr.bf16.mxu1 %v3302_v55 }
 0x587   :  { %3149 = vmatpush1.bf16.msra.mxu1 %v3148_v59 }
 0x588   :  { %3150 = vmatprep.subr.bf16.mxu1 %v3302_v55 }
 0x58b   :  { %3152 = vmatpush1.bf16.msra.mxu1 %v3151_v4 }
 0x58c   :  { %3153 = vmatprep.subr.bf16.mxu1 %v3302_v55 }
 0x58f   :  { %3155 = vmatpush1.bf16.msra.mxu1 %v3154_v24 }
 0x590   :  { %3156 = vmatprep.subr.bf16.mxu1 %v3302_v55 }
 0x593   :  { %3158 = vmatpush1.bf16.msra.mxu1 %v3157_v28 }
 0x596   :  { %2620 = vmatmul.mubr.f32.vlgmr.msra.gmra.mrb[14].mxu1 %v2476_v16 }
 0x645   :  { %v2844_v31 = vpop.f32.mrb[12].mxu1 }
 0x646   :  { %v2845_v15 = vpop.f32.mrb[13].mxu1 }
 0x647   :  { %v2846_v37 = vadd.f32 %v2845_v15, %v2844_v31 }
 0x649   :  { %v2552_v41 = vadd.f32 %v2846_v37, %v2808_v33 }
 0x669   :  { %v2621_v38 = vpop.f32.mrb[14].mxu1 }
 0x66a   :  { %v2622_v2 = vadd.f32 %v2621_v38, %v2552_v41  ;;  %v2623_v39 = vpop.f32.mrb[15].mxu1 }
 0x66c   :  { %3271 = vtanh.f32 %v2622_v2 }
 0x676   :  { %v3272_v55 = vpop.eup %3271 }
 0x677   :  { %2894 = vmatmul.mubr.msk.f32.vlgmr.msra.gmra.mrb[20].mxu0 %vm2648_vm6, %v3272_v55 }
 0x74a   :  { %v2718_v40 = vpop.f32.mrb[20].mxu0 }
 0x74b   :  { %v2719_v49 = vadd.f32 %v2810_v43, %v2718_v40  ;;  %v2895_v42 = vpop.f32.mrb[21].mxu0 }
 0x74d   :  { %3273 = vtanh.f32 %v2719_v49 }
 0x757   :  { %v3274_v6 = vpop.eup %3273 }
 0x758   :  { %2723 = vst [vmem:[#allocation2] sm:$0x3] %v3274_v6 }
 0x759   :  { %3286 = shalt.err (!%p3283_p4)
}
 0x75a   :  { %s3287_s10 = scalar_lea.hbm %s4832_s11, 32 }
 0x75b   :  { %p3288_p5 = scmp.ne.s32.totalorder %s4832_s11, %s3287_s10  ;;  %p3291_p6 = scmp.lt.u32.totalorder %s3287_s10, %s4832_s11 }
 0x75d   :  { %p3293_p7 = pnand %p3291_p6, %p3288_p5 }
 0x75f   :  { %3296 = shalt.err (!%p3293_p7)
}
 0x760   :  { %2733 = dma.vmem_to_hbm [thread:$0]  %s2731_s14, 32, %s4832_s11, [#allocation3]  }
 0x761   :  { %3297 = dma.done.wait [#allocation3], 32  }
 0x762   :  { %3298 = vsyncadd [#allocation3], 4294967264 }
 0x763   :  { %2737 = vsyncpa [#allocation3], 1 }

</bundles_post_ra>
